<compile_context>
chip_gen: v7x
topology: tpu7x:2x2x1
jax: 0.10.0
libtpu: 0.0.40
codegen_flags: <defaults>
</compile_context>

<pallas_src>
import jax
import jax.numpy as jnp
from jax.experimental import pallas as pl
from jax.experimental.pallas import tpu as pltpu

# --- module constants (from SNN_1d_hz.py) ------------------------------------
X_max = 2.0
X_min = 0.0
SUBSPACE_DIM = 300
NET_SIZE = [1, 100, 100, 100, 100, SUBSPACE_DIM, 1]
NORM_A = 2.0 / (X_max - X_min)                  # = 1.0
NORM_B = -1.0 - 2.0 * X_min / (X_max - X_min)   # = -1.0

# padded (lane-dense) dims used inside the kernel
HID_PAD = 128    # 100 -> 128
SUB_PAD = 384    # 300 -> 384


def _round_up(x, m):
    return ((x + m - 1) // m) * m


# --- Pallas kernel ------------------------------------------------------------
def _mlp_kernel(x_ref,
                w1_ref, b1_ref,
                w2_ref, b2_ref,
                w3_ref, b3_ref,
                w4_ref, b4_ref,
                w5_ref, b5_ref,
                w6_ref,
                out_ref):
    f32 = jnp.float32

    # NormalizeLayer fused with Linear(1,100): a K=1 matmul would waste a full
    # MXU pass, so do it as a VPU broadcast multiply-add instead.
    xn = NORM_A * x_ref[...] + NORM_B                     # (TILE_N, 1)
    h = jnp.tanh(xn * w1_ref[...] + b1_ref[...])          # (TILE_N, 128)

    # Hidden Linear(100,100) x3 + Tanh (padded to 128x128), f32 accumulation.
    mm_dtype = w2_ref.dtype
    h = jnp.tanh(jnp.dot(h.astype(mm_dtype), w2_ref[...],
                         preferred_element_type=f32) + b2_ref[...])
    h = jnp.tanh(jnp.dot(h.astype(mm_dtype), w3_ref[...],
                         preferred_element_type=f32) + b3_ref[...])
    h = jnp.tanh(jnp.dot(h.astype(mm_dtype), w4_ref[...],
                         preferred_element_type=f32) + b4_ref[...])
    # Linear(100,300) + Tanh (padded 128 -> 384): "subspace" hidden layer.
    h = jnp.tanh(jnp.dot(h.astype(mm_dtype), w5_ref[...],
                         preferred_element_type=f32) + b5_ref[...])

    # Linear(300,1, bias=False): elementwise mul + lane reduction (VPU/XLU)
    # instead of a one-output-column MXU pass.
    out_ref[...] = jnp.sum(h * w6_ref[...], axis=-1, keepdims=True)


# --- parameter padding (layout plumbing, mathematically exact) ----------------
def _pad_params(params, matmul_dtype=jnp.float32):
    def pad2(a, rows, cols):
        a = jnp.asarray(a, jnp.float32)
        return jnp.pad(a, ((0, rows - a.shape[0]), (0, cols - a.shape[1])))

    p = {}
    p["w1"] = pad2(params["w1"], 1, HID_PAD)                          # (1,128)
    p["b1"] = pad2(params["b1"], 1, HID_PAD)
    for k in ("w2", "w3", "w4"):
        p[k] = pad2(params[k], HID_PAD, HID_PAD).astype(matmul_dtype)
    for k in ("b2", "b3", "b4"):
        p[k] = pad2(params[k], 1, HID_PAD)
    p["w5"] = pad2(params["w5"], HID_PAD, SUB_PAD).astype(matmul_dtype)
    p["b5"] = pad2(params["b5"], 1, SUB_PAD)
    p["w6"] = pad2(params["w6"].T, 1, SUB_PAD)                        # (1,384)
    return p


# --- wrapper -------------------------------------------------------------------
def net_forward(x, params, *, tile_n=1024, matmul_dtype=jnp.float32):
    """x: (N, 1).  params: logical (in, out)-layout weights from init_params."""
    x = jnp.asarray(x, jnp.float32)
    n = x.shape[0]
    p = _pad_params(params, matmul_dtype)

    tile_n = int(max(8, min(tile_n, _round_up(n, 8))))
    n_pad = _round_up(n, tile_n)
    if n_pad != n:
        # padded rows flow through tanh harmlessly and are sliced off below
        x = jnp.pad(x, ((0, n_pad - n), (0, 0)))

    grid = (n_pad // tile_n,)
    row_spec = pl.BlockSpec((tile_n, 1), lambda i: (i, 0))

    def const_spec(shape):
        # weights/biases: same block every grid step -> stay VMEM resident
        return pl.BlockSpec(shape, lambda i: (0, 0))

    args = [x,
            p["w1"], p["b1"], p["w2"], p["b2"], p["w3"], p["b3"],
            p["w4"], p["b4"], p["w5"], p["b5"], p["w6"]]
    in_specs = [row_spec] + [const_spec(a.shape) for a in args[1:]]

    # advisory cost estimate for XLA scheduling around the custom call
    flops_row = 2 * (HID_PAD + 3 * HID_PAD * HID_PAD + HID_PAD * SUB_PAD + SUB_PAD)
    trans_row = 4 * HID_PAD + SUB_PAD
    w_bytes = sum(int(a.size) * a.dtype.itemsize for a in args[1:])
    cost = pl.CostEstimate(
        flops=n_pad * flops_row,
        transcendentals=n_pad * trans_row,
        bytes_accessed=n_pad * 8 + w_bytes,
    )

    out = pl.pallas_call(
        _mlp_kernel,
        out_shape=jax.ShapeDtypeStruct((n_pad, 1), jnp.float32),
        grid=grid,
        in_specs=in_specs,
        out_specs=row_spec,
        compiler_params=pltpu.CompilerParams(
            dimension_semantics=("parallel",),        # megacore sharding on v7x
            vmem_limit_bytes=32 * 1024 * 1024,        # explicit, works v5e/v6e/v7x
        ),
        cost_estimate=cost,
    )(*args)
    return out[:n]


# --- deterministic parameter construction --------------------------------------
def init_params(key):
    sizes = NET_SIZE
    params = {}
    keys = jax.random.split(key, 2 * (len(sizes) - 1))
    for i in range(len(sizes) - 1):
        fan_in, fan_out = sizes[i], sizes[i + 1]
        bound = 1.0 / jnp.sqrt(jnp.asarray(fan_in, jnp.float32))
        # stored as (in, out): kernel computes x @ W
        w = jax.random.uniform(keys[2 * i], (fan_in, fan_out),
                               minval=-bound, maxval=bound, dtype=jnp.float32)
        if i < len(sizes) - 2:
            b = jax.random.uniform(keys[2 * i + 1], (1, fan_out),
                                   minval=-bound, maxval=bound,
                                   dtype=jnp.float32)
            params[f"w{i+1}"] = w
            params[f"b{i+1}"] = b
        else:
            # last layer: Linear(300, 1, bias=False)
            params[f"w{i+1}"] = w
    return params


# --- pure-JAX reference (for sanity check) --------------------------------------
def net_forward_ref(x, p):
    h = NORM_A * x + NORM_B
    h = jnp.tanh(h @ p["w1"] + p["b1"])
    h = jnp.tanh(h @ p["w2"] + p["b2"])
    h = jnp.tanh(h @ p["w3"] + p["b3"])
    h = jnp.tanh(h @ p["w4"] + p["b4"])
    h = jnp.tanh(h @ p["w5"] + p["b5"])
    return h @ p["w6"]


if __name__ == "__main__":
    key = jax.random.PRNGKey(0)
    pkey, xkey = jax.random.split(key)
    params = init_params(pkey)

    # batch deliberately NOT a multiple of the tile to exercise row padding,
    # with tile_n=128 the grid is (3,) so multi-step pipelining is exercised too
    batch = 300
    x = jax.random.uniform(xkey, (batch, 1), minval=X_min, maxval=X_max,
                           dtype=jnp.float32)

    out = net_forward(x, params, tile_n=128)
    out = jax.block_until_ready(out)

    ref = net_forward_ref(x, params)
    assert out.shape == (batch, 1), out.shape
    max_err = float(jnp.max(jnp.abs(out - ref)))
    assert jnp.allclose(out, ref, atol=1e-4, rtol=1e-4), max_err

    print("KERNEL_OK")
</pallas_src>

<mosaic_0001>
module attributes {stable_mosaic.version = 11 : i64} {
  func.func @_mlp_kernel(%arg0: i32, %arg1: memref<128x1xf32, #tpu.memory_space<vmem>>, %arg2: memref<1x128xf32, #tpu.memory_space<vmem>>, %arg3: memref<1x128xf32, #tpu.memory_space<vmem>>, %arg4: memref<128x128xf32, #tpu.memory_space<vmem>>, %arg5: memref<1x128xf32, #tpu.memory_space<vmem>>, %arg6: memref<128x128xf32, #tpu.memory_space<vmem>>, %arg7: memref<1x128xf32, #tpu.memory_space<vmem>>, %arg8: memref<128x128xf32, #tpu.memory_space<vmem>>, %arg9: memref<1x128xf32, #tpu.memory_space<vmem>>, %arg10: memref<128x384xf32, #tpu.memory_space<vmem>>, %arg11: memref<1x384xf32, #tpu.memory_space<vmem>>, %arg12: memref<1x384xf32, #tpu.memory_space<vmem>>, %arg13: memref<128x1xf32, #tpu.memory_space<vmem>>) attributes {dimension_semantics = [#tpu.dimension_semantics<parallel>], iteration_bounds = array<i64: 3>, scalar_prefetch = 0 : i64, scratch_operands = 0 : i64, tpu.core_type = #tpu.core_type<tc>, window_params = [{transform_indices = @transform_0, window_bounds = array<i64: 128, 1>}, {pipeline_mode = #tpu.pipeline_mode<synchronous>, transform_indices = @transform_1, window_bounds = array<i64: 1, 128>}, {pipeline_mode = #tpu.pipeline_mode<synchronous>, transform_indices = @transform_2, window_bounds = array<i64: 1, 128>}, {pipeline_mode = #tpu.pipeline_mode<synchronous>, transform_indices = @transform_3, window_bounds = array<i64: 128, 128>}, {pipeline_mode = #tpu.pipeline_mode<synchronous>, transform_indices = @transform_4, window_bounds = array<i64: 1, 128>}, {pipeline_mode = #tpu.pipeline_mode<synchronous>, transform_indices = @transform_5, window_bounds = array<i64: 128, 128>}, {pipeline_mode = #tpu.pipeline_mode<synchronous>, transform_indices = @transform_6, window_bounds = array<i64: 1, 128>}, {pipeline_mode = #tpu.pipeline_mode<synchronous>, transform_indices = @transform_7, window_bounds = array<i64: 128, 128>}, {pipeline_mode = #tpu.pipeline_mode<synchronous>, transform_indices = @transform_8, window_bounds = array<i64: 1, 128>}, {pipeline_mode = #tpu.pipeline_mode<synchronous>, transform_indices = @transform_9, window_bounds = array<i64: 128, 384>}, {pipeline_mode = #tpu.pipeline_mode<synchronous>, transform_indices = @transform_10, window_bounds = array<i64: 1, 384>}, {pipeline_mode = #tpu.pipeline_mode<synchronous>, transform_indices = @transform_11, window_bounds = array<i64: 1, 384>}, {transform_indices = @transform_12, window_bounds = array<i64: 128, 1>}]} {
    %c0 = arith.constant 0 : index
    %c0_0 = arith.constant 0 : index
    %0 = vector.load %arg1[%c0, %c0_0] : memref<128x1xf32, #tpu.memory_space<vmem>>, vector<128x1xf32>
    %cst = arith.constant 1.000000e+00 : f32
    %1 = vector.broadcast %cst : f32 to vector<128x1xf32>
    %2 = arith.mulf %1, %0 : vector<128x1xf32>
    %cst_1 = arith.constant -1.000000e+00 : f32
    %3 = vector.broadcast %cst_1 : f32 to vector<128x1xf32>
    %4 = arith.addf %2, %3 : vector<128x1xf32>
    %c0_2 = arith.constant 0 : index
    %c0_3 = arith.constant 0 : index
    %5 = vector.load %arg2[%c0_2, %c0_3] : memref<1x128xf32, #tpu.memory_space<vmem>>, vector<1x128xf32>
    %6 = vector.broadcast %4 : vector<128x1xf32> to vector<128x128xf32>
    %7 = vector.broadcast %5 : vector<1x128xf32> to vector<128x128xf32>
    %8 = arith.mulf %6, %7 : vector<128x128xf32>
    %c0_4 = arith.constant 0 : index
    %c0_5 = arith.constant 0 : index
    %9 = vector.load %arg3[%c0_4, %c0_5] : memref<1x128xf32, #tpu.memory_space<vmem>>, vector<1x128xf32>
    %10 = vector.broadcast %9 : vector<1x128xf32> to vector<128x128xf32>
    %11 = arith.addf %8, %10 : vector<128x128xf32>
    %12 = math.tanh %11 : vector<128x128xf32>
    %c0_6 = arith.constant 0 : index
    %c0_7 = arith.constant 0 : index
    %13 = vector.load %arg4[%c0_6, %c0_7] : memref<128x128xf32, #tpu.memory_space<vmem>>, vector<128x128xf32>
    %cst_8 = arith.constant dense<0.000000e+00> : vector<128x128xf32>
    %14 = tpu.matmul %12, %13, %cst_8 {dimension_numbers = #tpu.dot_dimension_numbers<[1], [0], [0], [1], [0, 0, 1, 1], [], []>} : vector<128x128xf32>, vector<128x128xf32>, vector<128x128xf32> -> vector<128x128xf32>
    %c0_9 = arith.constant 0 : index
    %c0_10 = arith.constant 0 : index
    %15 = vector.load %arg5[%c0_9, %c0_10] : memref<1x128xf32, #tpu.memory_space<vmem>>, vector<1x128xf32>
    %16 = vector.broadcast %15 : vector<1x128xf32> to vector<128x128xf32>
    %17 = arith.addf %14, %16 : vector<128x128xf32>
    %18 = math.tanh %17 : vector<128x128xf32>
    %c0_11 = arith.constant 0 : index
    %c0_12 = arith.constant 0 : index
    %19 = vector.load %arg6[%c0_11, %c0_12] : memref<128x128xf32, #tpu.memory_space<vmem>>, vector<128x128xf32>
    %cst_13 = arith.constant dense<0.000000e+00> : vector<128x128xf32>
    %20 = tpu.matmul %18, %19, %cst_13 {dimension_numbers = #tpu.dot_dimension_numbers<[1], [0], [0], [1], [0, 0, 1, 1], [], []>} : vector<128x128xf32>, vector<128x128xf32>, vector<128x128xf32> -> vector<128x128xf32>
    %c0_14 = arith.constant 0 : index
    %c0_15 = arith.constant 0 : index
    %21 = vector.load %arg7[%c0_14, %c0_15] : memref<1x128xf32, #tpu.memory_space<vmem>>, vector<1x128xf32>
    %22 = vector.broadcast %21 : vector<1x128xf32> to vector<128x128xf32>
    %23 = arith.addf %20, %22 : vector<128x128xf32>
    %24 = math.tanh %23 : vector<128x128xf32>
    %c0_16 = arith.constant 0 : index
    %c0_17 = arith.constant 0 : index
    %25 = vector.load %arg8[%c0_16, %c0_17] : memref<128x128xf32, #tpu.memory_space<vmem>>, vector<128x128xf32>
    %cst_18 = arith.constant dense<0.000000e+00> : vector<128x128xf32>
    %26 = tpu.matmul %24, %25, %cst_18 {dimension_numbers = #tpu.dot_dimension_numbers<[1], [0], [0], [1], [0, 0, 1, 1], [], []>} : vector<128x128xf32>, vector<128x128xf32>, vector<128x128xf32> -> vector<128x128xf32>
    %c0_19 = arith.constant 0 : index
    %c0_20 = arith.constant 0 : index
    %27 = vector.load %arg9[%c0_19, %c0_20] : memref<1x128xf32, #tpu.memory_space<vmem>>, vector<1x128xf32>
    %28 = vector.broadcast %27 : vector<1x128xf32> to vector<128x128xf32>
    %29 = arith.addf %26, %28 : vector<128x128xf32>
    %30 = math.tanh %29 : vector<128x128xf32>
    %c0_21 = arith.constant 0 : index
    %c0_22 = arith.constant 0 : index
    %31 = vector.load %arg10[%c0_21, %c0_22] : memref<128x384xf32, #tpu.memory_space<vmem>>, vector<128x384xf32>
    %cst_23 = arith.constant dense<0.000000e+00> : vector<128x384xf32>
    %32 = tpu.matmul %30, %31, %cst_23 {dimension_numbers = #tpu.dot_dimension_numbers<[1], [0], [0], [1], [0, 0, 1, 1], [], []>} : vector<128x128xf32>, vector<128x384xf32>, vector<128x384xf32> -> vector<128x384xf32>
    %c0_24 = arith.constant 0 : index
    %c0_25 = arith.constant 0 : index
    %33 = vector.load %arg11[%c0_24, %c0_25] : memref<1x384xf32, #tpu.memory_space<vmem>>, vector<1x384xf32>
    %34 = vector.broadcast %33 : vector<1x384xf32> to vector<128x384xf32>
    %35 = arith.addf %32, %34 : vector<128x384xf32>
    %36 = math.tanh %35 : vector<128x384xf32>
    %c0_26 = arith.constant 0 : index
    %c0_27 = arith.constant 0 : index
    %37 = vector.load %arg12[%c0_26, %c0_27] : memref<1x384xf32, #tpu.memory_space<vmem>>, vector<1x384xf32>
    %38 = vector.broadcast %37 : vector<1x384xf32> to vector<128x384xf32>
    %39 = arith.mulf %36, %38 : vector<128x384xf32>
    %cst_28 = arith.constant dense<0.000000e+00> : vector<128xf32>
    %40 = vector.multi_reduction <add>, %39, %cst_28 [1] : vector<128x384xf32> to vector<128xf32>
    %41 = vector.shape_cast %40 : vector<128xf32> to vector<128x1xf32>
    %c0_29 = arith.constant 0 : index
    %c0_30 = arith.constant 0 : index
    %42 = vector.load %arg13[%c0_29, %c0_30] : memref<128x1xf32, #tpu.memory_space<vmem>>, vector<128x1xf32>
    tpu.vector_store %arg13[%c0_29, %c0_30], %41 {strides = array<i32>} : memref<128x1xf32, #tpu.memory_space<vmem>>, vector<128x1xf32>,
    return
  }
  func.func @transform_0(%arg0: i32) -> (i32, i32) {
    %c0_i32 = arith.constant 0 : i32
    %c0_i32_0 = arith.constant 0 : i32
    return %arg0, %c0_i32 : i32, i32
  }
  func.func @transform_1(%arg0: i32) -> (i32, i32) {
    %c0_i32 = arith.constant 0 : i32
    %c0_i32_0 = arith.constant 0 : i32
    %c0_i32_1 = arith.constant 0 : i32
    return %c0_i32, %c0_i32_0 : i32, i32
  }
  func.func @transform_2(%arg0: i32) -> (i32, i32) {
    %c0_i32 = arith.constant 0 : i32
    %c0_i32_0 = arith.constant 0 : i32
    %c0_i32_1 = arith.constant 0 : i32
    return %c0_i32, %c0_i32_0 : i32, i32
  }
  func.func @transform_3(%arg0: i32) -> (i32, i32) {
    %c0_i32 = arith.constant 0 : i32
    %c0_i32_0 = arith.constant 0 : i32
    %c0_i32_1 = arith.constant 0 : i32
    return %c0_i32, %c0_i32_0 : i32, i32
  }
  func.func @transform_4(%arg0: i32) -> (i32, i32) {
    %c0_i32 = arith.constant 0 : i32
    %c0_i32_0 = arith.constant 0 : i32
    %c0_i32_1 = arith.constant 0 : i32
    return %c0_i32, %c0_i32_0 : i32, i32
  }
  func.func @transform_5(%arg0: i32) -> (i32, i32) {
    %c0_i32 = arith.constant 0 : i32
    %c0_i32_0 = arith.constant 0 : i32
    %c0_i32_1 = arith.constant 0 : i32
    return %c0_i32, %c0_i32_0 : i32, i32
  }
  func.func @transform_6(%arg0: i32) -> (i32, i32) {
    %c0_i32 = arith.constant 0 : i32
    %c0_i32_0 = arith.constant 0 : i32
    %c0_i32_1 = arith.constant 0 : i32
    return %c0_i32, %c0_i32_0 : i32, i32
  }
  func.func @transform_7(%arg0: i32) -> (i32, i32) {
    %c0_i32 = arith.constant 0 : i32
    %c0_i32_0 = arith.constant 0 : i32
    %c0_i32_1 = arith.constant 0 : i32
    return %c0_i32, %c0_i32_0 : i32, i32
  }
  func.func @transform_8(%arg0: i32) -> (i32, i32) {
    %c0_i32 = arith.constant 0 : i32
    %c0_i32_0 = arith.constant 0 : i32
    %c0_i32_1 = arith.constant 0 : i32
    return %c0_i32, %c0_i32_0 : i32, i32
  }
  func.func @transform_9(%arg0: i32) -> (i32, i32) {
    %c0_i32 = arith.constant 0 : i32
    %c0_i32_0 = arith.constant 0 : i32
    %c0_i32_1 = arith.constant 0 : i32
    return %c0_i32, %c0_i32_0 : i32, i32
  }
  func.func @transform_10(%arg0: i32) -> (i32, i32) {
    %c0_i32 = arith.constant 0 : i32
    %c0_i32_0 = arith.constant 0 : i32
    %c0_i32_1 = arith.constant 0 : i32
    return %c0_i32, %c0_i32_0 : i32, i32
  }
  func.func @transform_11(%arg0: i32) -> (i32, i32) {
    %c0_i32 = arith.constant 0 : i32
    %c0_i32_0 = arith.constant 0 : i32
    %c0_i32_1 = arith.constant 0 : i32
    return %c0_i32, %c0_i32_0 : i32, i32
  }
  func.func @transform_12(%arg0: i32) -> (i32, i32) {
    %c0_i32 = arith.constant 0 : i32
    %c0_i32_0 = arith.constant 0 : i32
    return %arg0, %c0_i32 : i32, i32
  }
}

</mosaic_0001>

<bundles_post_ra>
// kernel: tpu_custom_call.1
= control target key start
LH: loop header
LB: loop body
LE: loop exit
PB: predicated region body
PF: predicated region fallthrough
CT: control target
= control target key end

     0   :  { %s3407_s0 = inlined_call_operand.vmem [shape: f32[384,1], index: 0, kind: input, shape index: {}]   ;;  %s3408_s1 = inlined_call_operand.vmem [shape: f32[1,128], index: 1, kind: input, shape index: {}]   ;;  %s3409_s2 = inlined_call_operand.vmem [shape: f32[1,128], index: 2, kind: input, shape index: {}]   ;;  %s3410_s3 = inlined_call_operand.hbm [shape: f32[128,128], index: 3, kind: input, shape index: {}]   ;;  %s3411_s4 = inlined_call_operand.vmem [shape: f32[1,128], index: 4, kind: input, shape index: {}]   ;;  %s3412_s5 = inlined_call_operand.hbm [shape: f32[128,128], index: 5, kind: input, shape index: {}]   ;;  %s3413_s6 = inlined_call_operand.vmem [shape: f32[1,128], index: 6, kind: input, shape index: {}]   ;;  %s3414_s7 = inlined_call_operand.hbm [shape: f32[128,128], index: 7, kind: input, shape index: {}]   ;;  %s3415_s8 = inlined_call_operand.vmem [shape: f32[1,128], index: 8, kind: input, shape index: {}]   ;;  %s3416_s9 = inlined_call_operand.vmem [shape: f32[128,384], index: 9, kind: input, shape index: {}]   ;;  %s3417_s10 = inlined_call_operand.vmem [shape: f32[1,384], index: 10, kind: input, shape index: {}]   ;;  %s3418_s11 = inlined_call_operand.vmem [shape: f32[1,384], index: 11, kind: input, shape index: {}]   ;;  %s3419_s12 = inlined_call_operand.vmem [shape: f32[384,1], index: 12, kind: output, shape index: {}]  }
   0x1   :  { %3424 = sst [smem:[#allocation9_spill]] %s3419_s12 }
   0x2   :  { %17 = vsyncpa [#allocation3], 0 }
   0x3   :  { %18 = vsyncpa [#allocation5], 0  ;;  %s2814_s21 = smov 0  }
   0x4 LB: > { %s3423_s22 = sadd.s32 4294967295, %s2740_s21   ;;  %p1841_p0 = scmp.ge.s32.totalorder %s2740_s21, 1  ;;  %s2740_s21 = sphi %s2814_s21, %s24_s21  }
   0x5   : > { %p312_p1 = scmp.lt.s32.totalorder %s2740_s21, 4  ;;  %p2824_p2 = scmp.eq.s32.totalorder %s3423_s22, 0 }
   0x6   : > { %s2742_s25 = smov [#allocation4]   ;;  %s2743_s27 = smov [#allocation2]  }
   0x7   : > { %s3425_s23 = scalar_select %p2824_p2, 1, 0 }
   0x8   : > { %p2828_p3 = pnand %p1841_p0, %p312_p1  ;;  %s346_s26 = sshll.u32 %s2742_s25, 4  ;;  %s347_s26 = int_to_ptr.vmem [resolvable:$true] %s346_s26 }
   0x9   : > { %s330_s28 = sshll.u32 %s2743_s27, 4  ;;  %s2744_s30 = smov [#allocation6]   ;;  %s2840_s28 = int_to_ptr.vmem [resolvable:$true] %s330_s28 }
   0xa   : > { %s3426_s24 = scalar_select %p2828_p3, 1, 0 }
   0xb   : > { %p2385_p4 = pneg %p2828_p3  ;;  %s362_s13 = sshll.u32 %s2744_s30, 4  ;;  %s2842_s13 = int_to_ptr.vmem [resolvable:$true] %s362_s13 }
   0xc   : > { %s2642_s16 = scalar_lea.hbm %s3412_s5, 2048 }
   0xd   : > { %p2836_p5 = pnand %p2824_p2, %p2385_p4  ;;  %p2643_p6 = scmp.ne.s32.totalorder %s3412_s5, %s2642_s16 }
   0xe   : > { %p2649_p10 = scmp.lt.u32.totalorder %s2642_s16, %s3412_s5 }
   0xf   : > { %p2852_p7 = pneg %p2836_p5 }
  0x11   : > { %p2645_p8 = pnand %p2852_p7, %p2643_p6 }
  0x13   : > { %p2646_p9 = pneg %p2645_p8 }
  0x15   : > { %p2651_p11 = pnand %p2649_p10, %p2646_p9 }
  0x17   : > { %2654 = shalt.err (!%p2651_p11)
}
  0x18   : > { %s2655_s27 = scalar_lea.vmem %s347_s26, 2048  ;;  %p2663_p1 = scmp.lt.s32.totalorder %s347_s26, %s347_s26 }
  0x19   : > { %p2656_p12 = scmp.ne.s32.totalorder %s347_s26, %s2655_s27  ;;  %p2664_p4 = scmp.lt.s32.totalorder %s2655_s27, %s2655_s27 }
  0x1b   : > { %p2658_p13 = pnand %p2656_p12, %p2852_p7  ;;  %p2665_p2 = por %p2664_p4, %p2663_p1 }
  0x1d   : > { %p2659_p0 = pneg %p2658_p13 }
  0x1f   : > { %p2666_p3 = pnand %p2665_p2, %p2659_p0 }
  0x21   : > { %2669 = shalt.err (!%p2666_p3)
}
  0x22   : > { %s2745_s30 = smov 128   ;;  %s2746_s14 = smov 8  }
  0x23   : > { %2391 = dma.hbm_to_vmem [thread:$0]  (!%p2836_p5), %s3412_s5, 2048, %s347_s26, [#allocation5], %s2745_s30, %s2745_s30, %s2746_s14  }
  0x24   : > { %s2670_s20 = scalar_lea.hbm %s3410_s3, 2048 }
  0x25   : > { %p2671_p2 = scmp.ne.s32.totalorder %s3410_s3, %s2670_s20  ;;  %p2677_p8 = scmp.lt.u32.totalorder %s2670_s20, %s3410_s3 }
  0x27   : > { %p2673_p3 = pnand %p2671_p2, %p2852_p7 }
  0x29   : > { %p2674_p6 = pneg %p2673_p3 }
  0x2b   : > { %p2679_p9 = pnand %p2677_p8, %p2674_p6 }
  0x2d   : > { %2682 = shalt.err (!%p2679_p9)
}
  0x2e   : > { %s2683_s26 = scalar_lea.vmem %s2840_s28, 2048  ;;  %p2691_p13 = scmp.lt.s32.totalorder %s2840_s28, %s2840_s28 }
  0x2f   : > { %p2684_p10 = scmp.ne.s32.totalorder %s2840_s28, %s2683_s26  ;;  %p2692_p0 = scmp.lt.s32.totalorder %s2683_s26, %s2683_s26 }
  0x31   : > { %p2686_p11 = pnand %p2684_p10, %p2852_p7  ;;  %p2693_p1 = por %p2692_p0, %p2691_p13 }
  0x33   : > { %p2687_p12 = pneg %p2686_p11 }
  0x35   : > { %p2694_p4 = pnand %p2693_p1, %p2687_p12 }
  0x37   : > { %2697 = shalt.err (!%p2694_p4)
}
  0x38   : > { %2388 = dma.hbm_to_vmem [thread:$0]  (!%p2836_p5), %s3410_s3, 2048, %s2840_s28, [#allocation3], %s2745_s30, %s2745_s30, %s2746_s14  }
  0x39   : > { %s2698_s17 = scalar_lea.hbm %s3414_s7, 2048 }
  0x3a   : > { %p2699_p2 = scmp.ne.s32.totalorder %s3414_s7, %s2698_s17  ;;  %p2705_p8 = scmp.lt.u32.totalorder %s2698_s17, %s3414_s7 }
  0x3c   : > { %p2701_p3 = pnand %p2699_p2, %p2852_p7 }
  0x3e   : > { %p2702_p6 = pneg %p2701_p3 }
  0x40   : > { %p2707_p9 = pnand %p2705_p8, %p2702_p6 }
  0x42   : > { %2710 = shalt.err (!%p2707_p9)
}
  0x43   : > { %s2711_s28 = scalar_lea.vmem %s2842_s13, 2048  ;;  %p2719_p13 = scmp.lt.s32.totalorder %s2842_s13, %s2842_s13 }
  0x44   : > { %p2712_p10 = scmp.ne.s32.totalorder %s2842_s13, %s2711_s28  ;;  %p2720_p0 = scmp.lt.s32.totalorder %s2711_s28, %s2711_s28 }
  0x46   : > { %p2714_p11 = pnand %p2712_p10, %p2852_p7  ;;  %p2721_p1 = por %p2720_p0, %p2719_p13 }
  0x48   : > { %p2715_p12 = pneg %p2714_p11 }
  0x4a   : > { %p2722_p4 = pnand %p2721_p1, %p2715_p12 }
  0x4c   : > { %2725 = shalt.err (!%p2722_p4)
}
  0x4d   : > { %2394 = dma.hbm_to_vmem [thread:$0]  (!%p2836_p5), %s3414_s7, 2048, %s2842_s13, [#allocation5], %s2745_s30, %s2745_s30, %s2746_s14  }
  0x4e   : > { %p3429_p2 = scmp.ne.s32.totalorder %s3426_s24, 0 }
  0x4f   : > { %p3430_p7 = scmp.ne.s32.totalorder (!%p3429_p2), %s3425_s23, 0 }
  0x50   : > { %399 = sbr.rel (%p3429_p2) target bundleno = 1362 (0x552), region = 68 }
  0x57   : > { %2731 = dma.done.wait (%p3430_p7), [#allocation3], 2048  }
  0x58   : > { %2733 = vsyncadd (%p3430_p7), [#allocation3], 4294965248 }
  0x59   : > { %2735 = dma.done.wait (%p3430_p7), [#allocation5], 4096  }
  0x5a   : > { %2737 = vsyncadd (%p3430_p7), [#allocation5], 4294963200  ;;  %s3431_s29 = sadd.s32 4294967295, %s2740_s21   ;;  %v2747_v0 = vmov 0   ;;  %v635_v11 = vld [vmem:[#allocation2] sm:$0xff]  ;;  %v636_v12 = vld [vmem:[#allocation2 + $0x8] sm:$0xff] }
  0x5b   : > { %s1850_s19 = sshll.u32 %s3431_s29, 4  ;;  %2417 = vset.pattern.permute.xlu1 %v2747_v0  ;;  %2416 = vset.pattern.permute.xlu0 %v2747_v0  ;;  %v2213_v13 = vpack.c.bf16 %v636_v12, %v635_v11  ;;  %v637_v14 = vld [vmem:[#allocation2 + $0x10] sm:$0xff]  ;;  %v638_v15 = vld [vmem:[#allocation2 + $0x18] sm:$0xff]  ;;  %v639_v19 = vld [vmem:[#allocation2 + $0x20] sm:$0xff]  ;;  %s3432_s23 = sld [smem:[#allocation9_spill]]  ;;  %vm1735_vm0 = vcmask 7168  }
  0x5c   : > { %p450_p5 = scmp.lt.s32.totalorder %s1850_s19, 47  ;;  %v2217_v18 = vpack.c.bf16 %v638_v15, %v637_v14  ;;  %v640_v20 = vld [vmem:[#allocation2 + $0x28] sm:$0xff]  ;;  %v641_v26 = vld [vmem:[#allocation2 + $0x30] sm:$0xff]  ;;  %v642_v27 = vld [vmem:[#allocation2 + $0x38] sm:$0xff] }
  0x5d   : > { %2214 = vmatprep.subr.bf16.mxu0 %v2213_v13  ;;  %v2221_v23 = vpack.c.bf16 %v640_v20, %v639_v19  ;;  %v2225_v30 = vpack.c.bf16 %v642_v27, %v641_v26  ;;  %v643_v33 = vld [vmem:[#allocation2 + $0x40] sm:$0xff]  ;;  %v644_v34 = vld [vmem:[#allocation2 + $0x48] sm:$0xff]  ;;  %v645_v40 = vld [vmem:[#allocation2 + $0x50] sm:$0xff] }
  0x5e   : > { %s3434_s19 = smov (!%p450_p5, %s1850_s19), 47  ;;  %2216 = vmatpush3.bf16.msra.mxu0 %v2213_v13  ;;  %v2229_v37 = vpack.c.bf16 %v644_v34, %v643_v33  ;;  %v646_v41 = vld [vmem:[#allocation2 + $0x58] sm:$0xff]  ;;  %v647_v47 = vld [vmem:[#allocation2 + $0x60] sm:$0xff]  ;;  %v648_v48 = vld [vmem:[#allocation2 + $0x68] sm:$0xff] }
  0x5f   : > { %s1851_s24 = sshll.u32 %s3434_s19, 3  ;;  %2218 = vmatprep.subr.bf16.mxu0 %v2217_v18  ;;  %v2233_v44 = vpack.c.bf16 %v646_v41, %v645_v40  ;;  %v2237_v51 = vpack.c.bf16 %v648_v48, %v647_v47  ;;  %v649_v54 = vld [vmem:[#allocation2 + $0x70] sm:$0xff]  ;;  %v650_v55 = vld [vmem:[#allocation2 + $0x78] sm:$0xff]  ;;  %v819_v57 = vld [vmem:[#allocation4] sm:$0xff] }
  0x60   : > { %s2943_s14 = scalar_lea.vmem %s3407_s0, %s1851_s24  ;;  %v2241_v56 = vpack.c.bf16 %v650_v55, %v649_v54  ;;  %v820_v58 = vld [vmem:[#allocation4 + $0x8] sm:$0xff]  ;;  %v821_v59 = vld [vmem:[#allocation4 + $0x10] sm:$0xff]  ;;  %v822_v61 = vld [vmem:[#allocation4 + $0x18] sm:$0xff] }
  0x61   : > { %v463_v1 = vld [vmem:[%s2943_s14 + $0x10] sm:$0xff]  ;;  %v461_v2 = vld [vmem:[%s2943_s14] sm:$0xff]  ;;  %v464_v3 = vld [vmem:[%s2943_s14 + $0x18] sm:$0xff]  ;;  %v2245_v60 = vpack.c.bf16 %v820_v58, %v819_v57  ;;  %v2249_v62 = vpack.c.bf16 %v822_v61, %v821_v59  ;;  %s3370_s22 = scalar_lea.vmem %s3432_s23, %s1851_s24 }
  0x62   : > { %v479_v4 = vadd.f32 -1.0, %v463_v1  ;;  %v477_v5 = vadd.f32 -1.0, %v461_v2  ;;  %v462_v6 = vld [vmem:[%s2943_s14 + $0x8] sm:$0xff]  ;;  %v480_v7 = vadd.f32 -1.0, %v464_v3  ;;  %v465_v10 = vld [vmem:[%s2943_s14 + $0x20] sm:$0xff]  ;;  %v468_v21 = vld [vmem:[%s2943_s14 + $0x38] sm:$0xff]  ;;  %2220 = vmatpush3.bf16.msra.mxu0 %v2217_v18 }
  0x63   : > { %v478_v8 = vadd.f32 -1.0, %v462_v6  ;;  %v466_v9 = vld [vmem:[%s2943_s14 + $0x28] sm:$0xff]  ;;  %v481_v17 = vadd.f32 -1.0, %v465_v10  ;;  %v467_v22 = vld [vmem:[%s2943_s14 + $0x30] sm:$0xff]  ;;  %v484_v24 = vadd.f32 -1.0, %v468_v21  ;;  %v469_v29 = vld [vmem:[%s2943_s14 + $0x40] sm:$0xff]  ;;  %2222 = vmatprep.subr.bf16.mxu0 %v2221_v23  ;;  %2246 = vmatprep.subr.bf16.mxu1 %v2245_v60 }
  0x64   : > { %506 = vperm.xlu1 %2417, %v479_v4   ;;  %496 = vperm.xlu0 %2416, %v477_v5   ;;  %v482_v16 = vadd.f32 -1.0, %v466_v9  ;;  %v483_v25 = vadd.f32 -1.0, %v467_v22  ;;  %v470_v28 = vld [vmem:[%s2943_s14 + $0x48] sm:$0xff]  ;;  %v485_v32 = vadd.f32 -1.0, %v469_v29  ;;  %v472_v35 = vld [vmem:[%s2943_s14 + $0x58] sm:$0xff]  ;;  %v471_v36 = vld [vmem:[%s2943_s14 + $0x50] sm:$0xff] }
  0x65   : > { %v486_v31 = vadd.f32 -1.0, %v470_v28  ;;  %v488_v38 = vadd.f32 -1.0, %v472_v35  ;;  %v487_v39 = vadd.f32 -1.0, %v471_v36  ;;  %v474_v42 = vld [vmem:[%s2943_s14 + $0x68] sm:$0xff]  ;;  %v473_v43 = vld [vmem:[%s2943_s14 + $0x60] sm:$0xff]  ;;  %v476_v49 = vld [vmem:[%s2943_s14 + $0x78] sm:$0xff]  ;;  %2248 = vmatpush3.bf16.msra.mxu1 %v2245_v60 }
  0x66   : > { %2224 = vmatpush3.bf16.msra.mxu0 %v2221_v23  ;;  %v490_v45 = vadd.f32 -1.0, %v474_v42  ;;  %v489_v46 = vadd.f32 -1.0, %v473_v43  ;;  %v475_v50 = vld [vmem:[%s2943_s14 + $0x70] sm:$0xff]  ;;  %v492_v52 = vadd.f32 -1.0, %v476_v49  ;;  %v823_v63 = vld [vmem:[#allocation4 + $0x20] sm:$0xff]  ;;  %v824_v0 = vld [vmem:[#allocation4 + $0x28] sm:$0xff]  ;;  %2250 = vmatprep.subr.bf16.mxu1 %v2249_v62 }
  0x67   : > { %2226 = vmatprep.subr.bf16.mxu0 %v2225_v30  ;;  %v491_v53 = vadd.f32 -1.0, %v475_v50  ;;  %v2253_v1 = vpack.c.bf16 %v824_v0, %v823_v63  ;;  %v825_v2 = vld [vmem:[#allocation4 + $0x30] sm:$0xff]  ;;  %v826_v3 = vld [vmem:[#allocation4 + $0x38] sm:$0xff]  ;;  %v2964_v5 = vld [vmem:[%s3408_s1] ss:$0 sm:$0xff] }
  0x68   : > { %511 = vperm.xlu1 %2417, %v480_v7   ;;  %501 = vperm.xlu0 %2416, %v478_v8   ;;  %v2257_v4 = vpack.c.bf16 %v826_v3, %v825_v2  ;;  %v2969_v6 = vld [vmem:[%s3409_s2] ss:$0 sm:$0xff] }
  0x69   : > { %2252 = vmatpush3.bf16.msra.mxu1 %v2249_v62 }
  0x6a   : > { %2228 = vmatpush3.bf16.msra.mxu0 %v2225_v30  ;;  %2254 = vmatprep.subr.bf16.mxu1 %v2253_v1 }
  0x6b   : > { %2230 = vmatprep.subr.bf16.mxu0 %v2229_v37 }
  0x6c   : > { %521 = vperm.xlu1 %2417, %v482_v16   ;;  %516 = vperm.xlu0 %2416, %v481_v17  }
  0x6d   : > { %2256 = vmatpush3.bf16.msra.mxu1 %v2253_v1 }
  0x6e   : > { %2232 = vmatpush3.bf16.msra.mxu0 %v2229_v37  ;;  %2258 = vmatprep.subr.bf16.mxu1 %v2257_v4 }
  0x6f   : > { %2234 = vmatprep.subr.bf16.mxu0 %v2233_v44 }
  0x70   : > { %531 = vperm.xlu1 %2417, %v484_v24   ;;  %526 = vperm.xlu0 %2416, %v483_v25  }
  0x71   : > { %2260 = vmatpush3.bf16.msra.mxu1 %v2257_v4 }
  0x72   : > { %2236 = vmatpush3.bf16.msra.mxu0 %v2233_v44 }
  0x73   : > { %2238 = vmatprep.subr.bf16.mxu0 %v2237_v51 }
  0x74   : > { %541 = vperm.xlu1 %2417, %v486_v31   ;;  %536 = vperm.xlu0 %2416, %v485_v32  }
  0x76   : > { %2240 = vmatpush3.bf16.msra.mxu0 %v2237_v51 }
  0x77   : > { %2242 = vmatprep.subr.bf16.mxu0 %v2241_v56 }
  0x78   : > { %551 = vperm.xlu1 %2417, %v488_v38   ;;  %546 = vperm.xlu0 %2416, %v487_v39  }
  0x7a   : > { %2244 = vmatpush3.bf16.msra.mxu0 %v2241_v56 }
  0x7c   : > { %561 = vperm.xlu1 %2417, %v490_v45   ;;  %556 = vperm.xlu0 %2416, %v489_v46  }
  0x80   : > { %571 = vperm.xlu1 %2417, %v492_v52   ;;  %566 = vperm.xlu0 %2416, %v491_v53  }
  0xe3   : > { %v507_v7 = vpop.permute.xlu1 %506  ;;  %v497_v8 = vpop.permute.xlu0 %496 }
  0xe4   : > { %v582_v9 = vmul.f32 %v2964_v5, %v507_v7  ;;  %v580_v10 = vmul.f32 %v2964_v5, %v497_v8  ;;  %v827_v8 = vld [vmem:[#allocation4 + $0x40] sm:$0xff] }
  0xe6   : > { %v603_v11 = vadd.f32 %v2969_v6, %v580_v10  ;;  %v605_v14 = vadd.f32 %v2969_v6, %v582_v9  ;;  %v828_v9 = vld [vmem:[#allocation4 + $0x48] sm:$0xff]  ;;  %v829_v10 = vld [vmem:[#allocation4 + $0x50] sm:$0xff] }
  0xe7   : > { %v512_v12 = vpop.permute.xlu1 %511  ;;  %v502_v13 = vpop.permute.xlu0 %501 }
  0xe8   : > { %v583_v15 = vmul.f32 %v2964_v5, %v512_v12  ;;  %v581_v16 = vmul.f32 %v2964_v5, %v502_v13  ;;  %2418 = vtanh.f32 %v603_v11  ;;  %v830_v11 = vld [vmem:[#allocation4 + $0x58] sm:$0xff]  ;;  %v831_v13 = vld [vmem:[#allocation4 + $0x60] sm:$0xff] }
  0xe9   : > { %2420 = vtanh.f32 %v605_v14  ;;  %v2265_v12 = vpack.c.bf16 %v830_v11, %v829_v10  ;;  %v832_v14 = vld [vmem:[#allocation4 + $0x68] sm:$0xff] }
  0xea   : > { %v604_v17 = vadd.f32 %v2969_v6, %v581_v16  ;;  %v606_v18 = vadd.f32 %v2969_v6, %v583_v15  ;;  %v2269_v15 = vpack.c.bf16 %v832_v14, %v831_v13  ;;  %v833_v16 = vld [vmem:[#allocation4 + $0x70] sm:$0xff] }
  0xeb   : > { %v522_v19 = vpop.permute.xlu1 %521  ;;  %v517_v20 = vpop.permute.xlu0 %516 }
  0xec   : > { %v585_v21 = vmul.f32 %v2964_v5, %v522_v19  ;;  %v584_v22 = vmul.f32 %v2964_v5, %v517_v20  ;;  %2422 = vtanh.f32 %v604_v17  ;;  %v834_v17 = vld [vmem:[#allocation4 + $0x78] sm:$0xff]  ;;  %v1003_v19 = vld [vmem:[#allocation6] sm:$0xff]  ;;  %v1004_v20 = vld [vmem:[#allocation6 + $0x8] sm:$0xff] }
  0xed   : > { %2424 = vtanh.f32 %v606_v18  ;;  %v2273_v18 = vpack.c.bf16 %v834_v17, %v833_v16 }
  0xee   : > { %v607_v23 = vadd.f32 %v2969_v6, %v584_v22  ;;  %v608_v26 = vadd.f32 %v2969_v6, %v585_v21  ;;  %v1005_v21 = vld [vmem:[#allocation6 + $0x10] sm:$0xff]  ;;  %v2277_v22 = vpack.c.bf16 %v1004_v20, %v1003_v19  ;;  %v1014_v20 = vld [vmem:[#allocation6 + $0x58] sm:$0xff] }
  0xef   : > { %v532_v24 = vpop.permute.xlu1 %531  ;;  %v527_v25 = vpop.permute.xlu0 %526  ;;  %v1013_v19 = vld [vmem:[#allocation6 + $0x50] sm:$0xff] }
  0xf0   : > { %v587_v27 = vmul.f32 %v2964_v5, %v532_v24  ;;  %v586_v28 = vmul.f32 %v2964_v5, %v527_v25  ;;  %2426 = vtanh.f32 %v607_v23  ;;  %v1006_v23 = vld [vmem:[#allocation6 + $0x18] sm:$0xff]  ;;  %v1007_v25 = vld [vmem:[#allocation6 + $0x20] sm:$0xff]  ;;  %2278 = vmatprep.subr.bf16.mxu0 %v2277_v22 }
  0xf1   : > { %2428 = vtanh.f32 %v608_v26  ;;  %v2281_v24 = vpack.c.bf16 %v1006_v23, %v1005_v21  ;;  %v1008_v26 = vld [vmem:[#allocation6 + $0x28] sm:$0xff]  ;;  %v2297_v21 = vpack.c.bf16 %v1014_v20, %v1013_v19  ;;  %v1201_v19 = vld [vmem:[%s3416_s9 + $0x70] sm:$0xff] }
  0xf2   : > { %v609_v29 = vadd.f32 %v2969_v6, %v586_v28  ;;  %v2419_v30 = vpop.eup %2418  ;;  %v610_v33 = vadd.f32 %v2969_v6, %v587_v27  ;;  %v2285_v27 = vpack.c.bf16 %v1008_v26, %v1007_v25  ;;  %v1009_v28 = vld [vmem:[#allocation6 + $0x30] sm:$0xff]  ;;  %v1016_v23 = vld [vmem:[#allocation6 + $0x68] sm:$0xff]  ;;  %v1018_v26 = vld [vmem:[#allocation6 + $0x78] sm:$0xff] }
  0xf3   : > { %v542_v31 = vpop.permute.xlu1 %541  ;;  %v537_v32 = vpop.permute.xlu0 %536  ;;  %2021 = vmatprep.mubr.f32.mxu0 %v2419_v30  ;;  %v1017_v25 = vld [vmem:[#allocation6 + $0x70] sm:$0xff]  ;;  %v1204_v20 = vld [vmem:[%s3416_s9 + $0x88] sm:$0xff] }
  0xf4   : > { %v589_v34 = vmul.f32 %v2964_v5, %v542_v31  ;;  %v588_v35 = vmul.f32 %v2964_v5, %v537_v32  ;;  %2430 = vtanh.f32 %v609_v29  ;;  %v2421_v36 = vpop.eup %2420  ;;  %v1010_v29 = vld [vmem:[#allocation6 + $0x38] sm:$0xff]  ;;  %v1011_v31 = vld [vmem:[#allocation6 + $0x40] sm:$0xff]  ;;  %v1012_v32 = vld [vmem:[#allocation6 + $0x48] sm:$0xff] }
  0xf5   : > { %2432 = vtanh.f32 %v610_v33  ;;  %v2289_v30 = vpack.c.bf16 %v1010_v29, %v1009_v28  ;;  %v2293_v33 = vpack.c.bf16 %v1012_v32, %v1011_v31  ;;  %v1188_v28 = vld [vmem:[%s3416_s9 + $0x8] sm:$0xff]  ;;  %v1191_v29 = vld [vmem:[%s3416_s9 + $0x20] sm:$0xff]  ;;  %v1190_v32 = vld [vmem:[%s3416_s9 + $0x18] sm:$0xff] }
  0xf6   : > { %v611_v37 = vadd.f32 %v2969_v6, %v588_v35  ;;  %v2423_v38 = vpop.eup %2422  ;;  %v612_v41 = vadd.f32 %v2969_v6, %v589_v34  ;;  %v3006_v34 = vld [vmem:[%s3411_s4] ss:$0 sm:$0xff]  ;;  %v2309_v31 = vpack.c.bf16 %v1191_v29, %v1188_v28  ;;  %v1210_v29 = vld [vmem:[%s3416_s9 + $0xb8] sm:$0xff] }
  0xf7   : > { %v552_v39 = vpop.permute.xlu1 %551  ;;  %v547_v40 = vpop.permute.xlu0 %546  ;;  %2022 = vmatmul.mubr.f32.vlgmr.msra.gmra.mrb[0].mxu0 %v2423_v38  ;;  %v1207_v28 = vld [vmem:[%s3416_s9 + $0xa0] sm:$0xff] }
  0xf8   : > { %v591_v42 = vmul.f32 %v2964_v5, %v552_v39  ;;  %v590_v43 = vmul.f32 %v2964_v5, %v547_v40  ;;  %v2425_v44 = vpop.eup %2424  ;;  %2434 = vtanh.f32 %v611_v37  ;;  %2024 = vmatprep.mubr.f32.mxu0 %v2421_v36  ;;  %2280 = vmatpush3.bf16.msra.mxu0 %v2277_v22  ;;  %v1015_v22 = vld [vmem:[#allocation6 + $0x60] sm:$0xff] }
  0xf9   : > { %2436 = vtanh.f32 %v612_v41  ;;  %2282 = vmatprep.subr.bf16.mxu0 %v2281_v24 }
  0xfa   : > { %v613_v45 = vadd.f32 %v2969_v6, %v590_v43  ;;  %v2427_v46 = vpop.eup %2426  ;;  %v614_v49 = vadd.f32 %v2969_v6, %v591_v42 }
  0xfb   : > { %v562_v47 = vpop.permute.xlu1 %561  ;;  %v557_v48 = vpop.permute.xlu0 %556  ;;  %2025 = vmatmul.mubr.f32.gmra.mrb[2].mxu0 %v2425_v44 }
  0xfc   : > { %v593_v50 = vmul.f32 %v2964_v5, %v562_v47  ;;  %v592_v51 = vmul.f32 %v2964_v5, %v557_v48  ;;  %2438 = vtanh.f32 %v613_v45  ;;  %2027 = vmatprep.mubr.f32.mxu0 %v2427_v46  ;;  %v2429_v52 = vpop.eup %2428  ;;  %2284 = vmatpush3.bf16.msra.mxu0 %v2281_v24  ;;  %v2301_v24 = vpack.c.bf16 %v1016_v23, %v1015_v22 }
  0xfd   : > { %2440 = vtanh.f32 %v614_v49  ;;  %2286 = vmatprep.subr.bf16.mxu0 %v2285_v27 }
  0xfe   : > { %v615_v53 = vadd.f32 %v2969_v6, %v592_v51  ;;  %v2431_v54 = vpop.eup %2430  ;;  %v616_v57 = vadd.f32 %v2969_v6, %v593_v50 }
  0xff   : > { %v572_v55 = vpop.permute.xlu1 %571  ;;  %v567_v56 = vpop.permute.xlu0 %566  ;;  %2028 = vmatmul.mubr.f32.gmra.mrb[4].mxu0 %v2429_v52 }
 0x100   : > { %v594_v58 = vmul.f32 %v2964_v5, %v567_v56  ;;  %2442 = vtanh.f32 %v615_v53  ;;  %v595_v59 = vmul.f32 %v2964_v5, %v572_v55  ;;  %2030 = vmatprep.mubr.f32.mxu0 %v2431_v54  ;;  %v2433_v60 = vpop.eup %2432  ;;  %2288 = vmatpush3.bf16.msra.mxu0 %v2285_v27  ;;  %v2305_v27 = vpack.c.bf16 %v1018_v26, %v1017_v25 }
 0x101   : > { %2444 = vtanh.f32 %v616_v57  ;;  %2290 = vmatprep.subr.bf16.mxu0 %v2289_v30  ;;  %v2349_v26 = vpack.c.bf16 %v1204_v20, %v1201_v19  ;;  %v1234_v19 = vld [vmem:[%s3416_s9 + $0x178] sm:$0xff] }
 0x102   : > { %v617_v61 = vadd.f32 %v2969_v6, %v594_v58  ;;  %v2435_v62 = vpop.eup %2434  ;;  %v618_v63 = vadd.f32 %v2969_v6, %v595_v59  ;;  %v2261_v6 = vpack.c.bf16 %v828_v9, %v827_v8 }
 0x103   : > { %2031 = vmatmul.mubr.f32.gmra.mrb[6].mxu0 %v2433_v60  ;;  %v2437_v0 = vpop.eup %2436 }
 0x104   : > { %2446 = vtanh.f32 %v617_v61  ;;  %2033 = vmatprep.mubr.f32.mxu0 %v2435_v62  ;;  %2262 = vmatprep.subr.bf16.mxu1 %v2261_v6 }
 0x105   : > { %2448 = vtanh.f32 %v618_v63  ;;  %2264 = vmatpush3.bf16.msra.mxu1 %v2261_v6  ;;  %2292 = vmatpush3.bf16.msra.mxu0 %v2289_v30  ;;  %v1187_v30 = vld [vmem:[%s3416_s9] sm:$0xff] }
 0x106   : > { %v2439_v1 = vpop.eup %2438  ;;  %2266 = vmatprep.subr.bf16.mxu1 %v2265_v12  ;;  %2294 = vmatprep.subr.bf16.mxu0 %v2293_v33 }
 0x107   : > { %2034 = vmatmul.mubr.f32.gmra.mrb[8].mxu0 %v2437_v0  ;;  %v2441_v2 = vpop.eup %2440 }
 0x108   : > { %2036 = vmatprep.mubr.f32.mxu0 %v2439_v1 }
 0x109   : > { %2268 = vmatpush3.bf16.msra.mxu1 %v2265_v12  ;;  %2296 = vmatpush3.bf16.msra.mxu0 %v2293_v33  ;;  %v1189_v33 = vld [vmem:[%s3416_s9 + $0x10] sm:$0xff] }
 0x10a   : > { %v2443_v3 = vpop.eup %2442  ;;  %2270 = vmatprep.subr.bf16.mxu1 %v2269_v15  ;;  %2298 = vmatprep.subr.bf16.mxu0 %v2297_v21 }
 0x10b   : > { %2037 = vmatmul.mubr.f32.gmra.mrb[10].mxu0 %v2441_v2  ;;  %v2445_v4 = vpop.eup %2444 }
 0x10c   : > { %2039 = vmatprep.mubr.f32.mxu0 %v2443_v3 }
 0x10d   : > { %2272 = vmatpush3.bf16.msra.mxu1 %v2269_v15  ;;  %2300 = vmatpush3.bf16.msra.mxu0 %v2297_v21 }
 0x10e   : > { %v2447_v5 = vpop.eup %2446  ;;  %2274 = vmatprep.subr.bf16.mxu1 %v2273_v18  ;;  %2302 = vmatprep.subr.bf16.mxu0 %v2301_v24 }
 0x10f   : > { %2040 = vmatmul.mubr.f32.gmra.mrb[12].mxu0 %v2445_v4  ;;  %v2449_v7 = vpop.eup %2448 }
 0x110   : > { %2042 = vmatprep.mubr.f32.mxu0 %v2447_v5 }
 0x111   : > { %2276 = vmatpush3.bf16.msra.mxu1 %v2273_v18  ;;  %2304 = vmatpush3.bf16.msra.mxu0 %v2301_v24 }
 0x112   : > { %2306 = vmatprep.subr.bf16.mxu0 %v2305_v27  ;;  %2310 = vmatprep.subr.bf16.mxu1 %v2309_v31 }
 0x113   : > { %2043 = vmatmul.mubr.f32.gmra.mrb[14].mxu0 %v2449_v7 }
 0x115   : > { %2308 = vmatpush3.bf16.msra.mxu0 %v2305_v27 }
 0x1ca   : > { %v2023_v35 = vpop.f32.mrb[0].mxu0 }
 0x1cb   : > { %v730_v36 = vadd.f32 %v2023_v35, %v3006_v34  ;;  %v724_v37 = vpop.f32.mrb[1].mxu0  ;;  %v2311_v35 = vpack.c.bf16 %v1190_v32, %v1187_v30 }
 0x1cc   : > { %v725_v38 = vadd.f32 %v3006_v34, %v724_v37  ;;  %v1194_v37 = vld [vmem:[%s3416_s9 + $0x38] sm:$0xff] }
 0x1ce   : > { %2450 = vtanh.f32 %v725_v38  ;;  %v2026_v39 = vpop.f32.mrb[2].mxu0  ;;  %v1197_v38 = vld [vmem:[%s3416_s9 + $0x50] sm:$0xff] }
 0x1cf   : > { %2452 = vtanh.f32 %v730_v36  ;;  %v740_v40 = vadd.f32 %v2026_v39, %v3006_v34  ;;  %v734_v41 = vpop.f32.mrb[3].mxu0  ;;  %v1193_v39 = vld [vmem:[%s3416_s9 + $0x30] sm:$0xff] }
 0x1d0   : > { %v735_v42 = vadd.f32 %v3006_v34, %v734_v41  ;;  %v1196_v41 = vld [vmem:[%s3416_s9 + $0x48] sm:$0xff] }
 0x1d2   : > { %2454 = vtanh.f32 %v735_v42  ;;  %v2029_v43 = vpop.f32.mrb[4].mxu0  ;;  %v2315_v42 = vpack.c.bf16 %v1196_v41, %v1193_v39 }
 0x1d3   : > { %2456 = vtanh.f32 %v740_v40  ;;  %v750_v44 = vadd.f32 %v2029_v43, %v3006_v34  ;;  %v744_v45 = vpop.f32.mrb[5].mxu0  ;;  %v2313_v40 = vpack.c.bf16 %v1197_v38, %v1194_v37  ;;  %v1200_v43 = vld [vmem:[%s3416_s9 + $0x68] sm:$0xff] }
 0x1d4   : > { %v745_v46 = vadd.f32 %v3006_v34, %v744_v45 }
 0x1d6   : > { %2458 = vtanh.f32 %v745_v46  ;;  %v2032_v47 = vpop.f32.mrb[6].mxu0  ;;  %v1199_v46 = vld [vmem:[%s3416_s9 + $0x60] sm:$0xff] }
 0x1d7   : > { %2460 = vtanh.f32 %v750_v44  ;;  %v760_v48 = vadd.f32 %v2032_v47, %v3006_v34  ;;  %v754_v49 = vpop.f32.mrb[7].mxu0  ;;  %v1203_v44 = vld [vmem:[%s3416_s9 + $0x80] sm:$0xff]  ;;  %v1202_v47 = vld [vmem:[%s3416_s9 + $0x78] sm:$0xff] }
 0x1d8   : > { %v2451_v50 = vpop.eup %2450  ;;  %v755_v51 = vadd.f32 %v3006_v34, %v754_v49  ;;  %v2317_v45 = vpack.c.bf16 %v1203_v44, %v1200_v43  ;;  %v1209_v49 = vld [vmem:[%s3416_s9 + $0xb0] sm:$0xff] }
 0x1d9   : > { %v2453_v52 = vpop.eup %2452  ;;  %2077 = vmatprep.mubr.f32.mxu1 %v2451_v50  ;;  %v2319_v50 = vpack.c.bf16 %v1202_v47, %v1199_v46 }
 0x1da   : > { %2462 = vtanh.f32 %v755_v51  ;;  %v2035_v53 = vpop.f32.mrb[8].mxu0  ;;  %2078 = vmatmul.mubr.f32.vlgmr.msra.gmra.mrb[0].mxu1 %v2453_v52  ;;  %v1205_v52 = vld [vmem:[%s3416_s9 + $0x90] sm:$0xff] }
 0x1db   : > { %2464 = vtanh.f32 %v760_v48  ;;  %v770_v54 = vadd.f32 %v2035_v53, %v3006_v34  ;;  %v764_v55 = vpop.f32.mrb[9].mxu0  ;;  %2312 = vmatpush1.bf16.msra.mxu1 %v2311_v35  ;;  %v1206_v48 = vld [vmem:[%s3416_s9 + $0x98] sm:$0xff]  ;;  %v1208_v53 = vld [vmem:[%s3416_s9 + $0xa8] sm:$0xff]  ;;  %v2353_v35 = vpack.c.bf16 %v1210_v29, %v1207_v28 }
 0x1dc   : > { %v2455_v56 = vpop.eup %2454  ;;  %v765_v57 = vadd.f32 %v3006_v34, %v764_v55  ;;  %2314 = vmatprep.subr.bf16.mxu1 %v2313_v40  ;;  %v2321_v51 = vpack.c.bf16 %v1209_v49, %v1206_v48  ;;  %v1215_v55 = vld [vmem:[%s3416_s9 + $0xe0] sm:$0xff] }
 0x1dd   : > { %v2457_v58 = vpop.eup %2456  ;;  %2080 = vmatprep.mubr.f32.mxu1 %v2455_v56  ;;  %v2323_v56 = vpack.c.bf16 %v1208_v53, %v1205_v52 }
 0x1de   : > { %2466 = vtanh.f32 %v765_v57  ;;  %v2038_v59 = vpop.f32.mrb[10].mxu0  ;;  %2081 = vmatmul.mubr.f32.gmra.mrb[2].mxu1 %v2457_v58  ;;  %v1211_v58 = vld [vmem:[%s3416_s9 + $0xc0] sm:$0xff] }
 0x1df   : > { %2468 = vtanh.f32 %v770_v54  ;;  %v780_v60 = vadd.f32 %v2038_v59, %v3006_v34  ;;  %v774_v61 = vpop.f32.mrb[11].mxu0  ;;  %2316 = vmatpush1.bf16.msra.mxu1 %v2315_v42  ;;  %v1212_v54 = vld [vmem:[%s3416_s9 + $0xc8] sm:$0xff]  ;;  %v1214_v59 = vld [vmem:[%s3416_s9 + $0xd8] sm:$0xff] }
 0x1e0   : > { %v2459_v62 = vpop.eup %2458  ;;  %v775_v63 = vadd.f32 %v3006_v34, %v774_v61  ;;  %2318 = vmatprep.subr.bf16.mxu1 %v2317_v45  ;;  %v2325_v57 = vpack.c.bf16 %v1215_v55, %v1212_v54  ;;  %v3096_v61 = vld [vmem:[%s3413_s6] ss:$0 sm:$0xff]  ;;  %v1213_v55 = vld [vmem:[%s3416_s9 + $0xd0] sm:$0xff] }
 0x1e1   : > { %v2461_v0 = vpop.eup %2460  ;;  %2083 = vmatprep.mubr.f32.mxu1 %v2459_v62 }
 0x1e2   : > { %2470 = vtanh.f32 %v775_v63  ;;  %v2041_v1 = vpop.f32.mrb[12].mxu0  ;;  %2084 = vmatmul.mubr.f32.gmra.mrb[4].mxu1 %v2461_v0 }
 0x1e3   : > { %2472 = vtanh.f32 %v780_v60  ;;  %v790_v2 = vadd.f32 %v2041_v1, %v3006_v34  ;;  %v784_v3 = vpop.f32.mrb[13].mxu0  ;;  %2320 = vmatpush1.bf16.msra.mxu1 %v2319_v50  ;;  %v2327_v60 = vpack.c.bf16 %v1214_v59, %v1211_v58  ;;  %v1218_v58 = vld [vmem:[%s3416_s9 + $0xf8] sm:$0xff]  ;;  %v1221_v59 = vld [vmem:[%s3416_s9 + $0x110] sm:$0xff] }
 0x1e4   : > { %v2463_v4 = vpop.eup %2462  ;;  %v785_v5 = vadd.f32 %v3006_v34, %v784_v3  ;;  %2322 = vmatprep.subr.bf16.mxu1 %v2321_v51 }
 0x1e5   : > { %v2465_v7 = vpop.eup %2464  ;;  %2086 = vmatprep.mubr.f32.mxu1 %v2463_v4 }
 0x1e6   : > { %2474 = vtanh.f32 %v785_v5  ;;  %v2044_v8 = vpop.f32.mrb[14].mxu0  ;;  %2087 = vmatmul.mubr.f32.gmra.mrb[6].mxu1 %v2465_v7 }
 0x1e7   : > { %2476 = vtanh.f32 %v790_v2  ;;  %v800_v9 = vadd.f32 %v2044_v8, %v3006_v34  ;;  %v794_v6 = vpop.f32.mrb[15].mxu0  ;;  %2324 = vmatpush1.bf16.msra.mxu1 %v2323_v56  ;;  %v1216_v56 = vld [vmem:[%s3416_s9 + $0xe8] sm:$0xff] }
 0x1e8   : > { %v2467_v10 = vpop.eup %2466  ;;  %v795_v11 = vadd.f32 %v3006_v34, %v794_v6  ;;  %v1192_v34 = vld [vmem:[%s3416_s9 + $0x28] sm:$0xff]  ;;  %2326 = vmatprep.subr.bf16.mxu1 %v2325_v57  ;;  %v2357_v57 = vpack.c.bf16 %v1216_v56, %v1213_v55 }
 0x1e9   : > { %v2469_v12 = vpop.eup %2468  ;;  %2089 = vmatprep.mubr.f32.mxu1 %v2467_v10  ;;  %v3042_v36 = vpack.c.bf16 %v1192_v34, %v1189_v33  ;;  %v1195_v10 = vld [vmem:[%s3416_s9 + $0x40] sm:$0xff] }
 0x1ea   : > { %2478 = vtanh.f32 %v795_v11  ;;  %2090 = vmatmul.mubr.f32.gmra.mrb[8].mxu1 %v2469_v12  ;;  %v1198_v11 = vld [vmem:[%s3416_s9 + $0x58] sm:$0xff] }
 0x1eb   : > { %2480 = vtanh.f32 %v800_v9  ;;  %2342 = vmatprep.subr.bf16.mxu0 %v3042_v36  ;;  %2328 = vmatpush1.bf16.msra.mxu1 %v2327_v60  ;;  %v2329_v60 = vpack.c.bf16 %v1221_v59, %v1218_v58 }
 0x1ec   : > { %v2471_v13 = vpop.eup %2470 }
 0x1ed   : > { %v2473_v14 = vpop.eup %2472  ;;  %2092 = vmatprep.mubr.f32.mxu1 %v2471_v13  ;;  %2330 = vmatprep.subr.bf16.mxu1 %v2329_v60 }
 0x1ee   : > { %2093 = vmatmul.mubr.f32.gmra.mrb[10].mxu1 %v2473_v14 }
 0x1f0   : > { %v2475_v15 = vpop.eup %2474 }
 0x1f1   : > { %v2477_v16 = vpop.eup %2476  ;;  %2095 = vmatprep.mubr.f32.mxu1 %v2475_v15 }
 0x1f2   : > { %2096 = vmatmul.mubr.f32.gmra.mrb[12].mxu1 %v2477_v16 }
 0x1f4   : > { %v2479_v17 = vpop.eup %2478 }
 0x1f5   : > { %v2481_v18 = vpop.eup %2480  ;;  %2098 = vmatprep.mubr.f32.mxu1 %v2479_v17  ;;  %v2345_v17 = vpack.c.bf16 %v1198_v11, %v1195_v10  ;;  %v1228_v10 = vld [vmem:[%s3416_s9 + $0x148] sm:$0xff] }
 0x1f6   : > { %2099 = vmatmul.mubr.f32.gmra.mrb[14].mxu1 %v2481_v18 }
 0x2ad   : > { %v2079_v62 = vpop.f32.mrb[0].mxu1 }
 0x2ae   : > { %v914_v63 = vadd.f32 %v2079_v62, %v3096_v61  ;;  %v908_v0 = vpop.f32.mrb[1].mxu1  ;;  %v1220_v62 = vld [vmem:[%s3416_s9 + $0x108] sm:$0xff] }
 0x2af   : > { %v909_v1 = vadd.f32 %v3096_v61, %v908_v0 }
 0x2b1   : > { %2482 = vtanh.f32 %v909_v1  ;;  %v2082_v2 = vpop.f32.mrb[2].mxu1  ;;  %v1222_v1 = vld [vmem:[%s3416_s9 + $0x118] sm:$0xff] }
 0x2b2   : > { %2484 = vtanh.f32 %v914_v63  ;;  %v924_v3 = vadd.f32 %v2082_v2, %v3096_v61  ;;  %v918_v4 = vpop.f32.mrb[3].mxu1  ;;  %v1219_v63 = vld [vmem:[%s3416_s9 + $0x100] sm:$0xff] }
 0x2b3   : > { %v919_v5 = vadd.f32 %v3096_v61, %v918_v4  ;;  %v2361_v2 = vpack.c.bf16 %v1222_v1, %v1219_v63  ;;  %v1227_v4 = vld [vmem:[%s3416_s9 + $0x140] sm:$0xff] }
 0x2b5   : > { %2486 = vtanh.f32 %v919_v5  ;;  %v2085_v7 = vpop.f32.mrb[4].mxu1 }
 0x2b6   : > { %2488 = vtanh.f32 %v924_v3  ;;  %v934_v8 = vadd.f32 %v2085_v7, %v3096_v61  ;;  %v928_v9 = vpop.f32.mrb[5].mxu1  ;;  %v1224_v3 = vld [vmem:[%s3416_s9 + $0x128] sm:$0xff]  ;;  %v1223_v7 = vld [vmem:[%s3416_s9 + $0x120] sm:$0xff] }
 0x2b7   : > { %v929_v6 = vadd.f32 %v3096_v61, %v928_v9  ;;  %v2333_v5 = vpack.c.bf16 %v1227_v4, %v1224_v3  ;;  %v1225_v9 = vld [vmem:[%s3416_s9 + $0x130] sm:$0xff] }
 0x2b8   : > { %v2365_v11 = vpack.c.bf16 %v1228_v10, %v1225_v9  ;;  %v1235_v10 = vld [vmem:[%s3417_s10] sm:$0x7] }
 0x2b9   : > { %2490 = vtanh.f32 %v929_v6  ;;  %v2088_v12 = vpop.f32.mrb[6].mxu1 }
 0x2ba   : > { %2492 = vtanh.f32 %v934_v8  ;;  %v944_v13 = vadd.f32 %v2088_v12, %v3096_v61  ;;  %v938_v14 = vpop.f32.mrb[7].mxu1  ;;  %v1226_v8 = vld [vmem:[%s3416_s9 + $0x138] sm:$0xff] }
 0x2bb   : > { %v2483_v15 = vpop.eup %2482  ;;  %v939_v16 = vadd.f32 %v3096_v61, %v938_v14  ;;  %v2335_v6 = vpack.c.bf16 %v1226_v8, %v1223_v7  ;;  %v1230_v12 = vld [vmem:[%s3416_s9 + $0x158] sm:$0xff]  ;;  %v1237_v8 = vlaneseq }
 0x2bc   : > { %v2485_v18 = vpop.eup %2484  ;;  %2133 = vmatprep.mubr.f32.mxu0 %v2483_v15  ;;  %v1229_v15 = vld [vmem:[%s3416_s9 + $0x150] sm:$0xff] }
 0x2bd   : > { %2494 = vtanh.f32 %v939_v16  ;;  %v2091_v21 = vpop.f32.mrb[8].mxu1  ;;  %2134 = vmatmul.mubr.f32.vlgmr.msra.gmra.mrb[16].mxu0 %v2485_v18  ;;  %v1232_v16 = vld [vmem:[%s3416_s9 + $0x168] sm:$0xff]  ;;  %v1238_v9 = vshrl.u32 %v1237_v8, 7 }
 0x2be   : > { %2496 = vtanh.f32 %v944_v13  ;;  %v954_v22 = vadd.f32 %v2091_v21, %v3096_v61  ;;  %v948_v23 = vpop.f32.mrb[9].mxu1  ;;  %2344 = vmatpush3.bf16.msra.mxu0 %v3042_v36  ;;  %v1233_v13 = vld [vmem:[%s3416_s9 + $0x170] sm:$0xff]  ;;  %v2339_v18 = vpack.c.bf16 %v1232_v16, %v1229_v15  ;;  %v2748_v21 = vmov 0.0  }
 0x2bf   : > { %v2487_v24 = vpop.eup %2486  ;;  %v949_v25 = vadd.f32 %v3096_v61, %v948_v23  ;;  %2346 = vmatprep.subr.bf16.mxu0 %v2345_v17  ;;  %v2337_v14 = vpack.c.bf16 %v1233_v13, %v1230_v12  ;;  %1316 = vmatprep.mubr.f32.mxu1 %v2748_v21  ;;  %v1247_v12 = vsub.s32 2, %v1238_v9 }
 0x2c0   : > { %v2489_v27 = vpop.eup %2488  ;;  %2136 = vmatprep.mubr.f32.mxu0 %v2487_v24 }
 0x2c1   : > { %2498 = vtanh.f32 %v949_v25  ;;  %v2094_v30 = vpop.f32.mrb[10].mxu1  ;;  %2137 = vmatmul.mubr.f32.gmra.mrb[18].mxu0 %v2489_v27  ;;  %v3237_v15 = vrot.slane %v1235_v10, %v1247_v12 }
 0x2c2   : > { %2500 = vtanh.f32 %v954_v22  ;;  %v964_v31 = vadd.f32 %v2094_v30, %v3096_v61  ;;  %v958_v32 = vpop.f32.mrb[11].mxu1  ;;  %2348 = vmatpush3.bf16.msra.mxu0 %v2345_v17  ;;  %v1231_v17 = vld [vmem:[%s3416_s9 + $0x160] sm:$0xff] }
 0x2c3   : > { %v2491_v33 = vpop.eup %2490  ;;  %v959_v34 = vadd.f32 %v3096_v61, %v958_v32  ;;  %2350 = vmatprep.subr.bf16.mxu0 %v2349_v26  ;;  %v2369_v20 = vpack.c.bf16 %v1234_v19, %v1231_v17  ;;  %v3197_v22 = vld [vmem:[%s3415_s8] ss:$0 sm:$0xff] }
 0x2c4   : > { %v2493_v36 = vpop.eup %2492  ;;  %2139 = vmatprep.mubr.f32.mxu0 %v2491_v33 }
 0x2c5   : > { %2502 = vtanh.f32 %v959_v34  ;;  %v2097_v37 = vpop.f32.mrb[12].mxu1  ;;  %2140 = vmatmul.mubr.f32.gmra.mrb[20].mxu0 %v2493_v36 }
 0x2c6   : > { %2504 = vtanh.f32 %v964_v31  ;;  %v974_v38 = vadd.f32 %v2097_v37, %v3096_v61  ;;  %v968_v39 = vpop.f32.mrb[13].mxu1  ;;  %2352 = vmatpush3.bf16.msra.mxu0 %v2349_v26 }
 0x2c7   : > { %v2495_v40 = vpop.eup %2494  ;;  %v969_v41 = vadd.f32 %v3096_v61, %v968_v39  ;;  %2354 = vmatprep.subr.bf16.mxu0 %v2353_v35 }
 0x2c8   : > { %v2497_v42 = vpop.eup %2496  ;;  %2142 = vmatprep.mubr.f32.mxu0 %v2495_v40 }
 0x2c9   : > { %2506 = vtanh.f32 %v969_v41  ;;  %v2100_v43 = vpop.f32.mrb[14].mxu1  ;;  %2143 = vmatmul.mubr.f32.gmra.mrb[22].mxu0 %v2497_v42 }
 0x2ca   : > { %2508 = vtanh.f32 %v974_v38  ;;  %v984_v44 = vadd.f32 %v2100_v43, %v3096_v61  ;;  %v978_v45 = vpop.f32.mrb[15].mxu1  ;;  %2356 = vmatpush3.bf16.msra.mxu0 %v2353_v35 }
 0x2cb   : > { %v2499_v46 = vpop.eup %2498  ;;  %v979_v47 = vadd.f32 %v3096_v61, %v978_v45  ;;  %2358 = vmatprep.subr.bf16.mxu0 %v2357_v57  ;;  %v1217_v61 = vld [vmem:[%s3416_s9 + $0xf0] sm:$0xff] }
 0x2cc   : > { %v2501_v48 = vpop.eup %2500  ;;  %2145 = vmatprep.mubr.f32.mxu0 %v2499_v46  ;;  %v2331_v0 = vpack.c.bf16 %v1220_v62, %v1217_v61 }
 0x2cd   : > { %2510 = vtanh.f32 %v979_v47  ;;  %2146 = vmatmul.mubr.f32.gmra.mrb[24].mxu0 %v2501_v48 }
 0x2ce   : > { %2512 = vtanh.f32 %v984_v44  ;;  %2360 = vmatpush3.bf16.msra.mxu0 %v2357_v57  ;;  %2332 = vmatpush1.bf16.msra.mxu1 %v2331_v0 }
 0x2cf   : > { %v2503_v49 = vpop.eup %2502  ;;  %2362 = vmatprep.subr.bf16.mxu0 %v2361_v2  ;;  %2334 = vmatprep.subr.bf16.mxu1 %v2333_v5 }
 0x2d0   : > { %v2505_v50 = vpop.eup %2504  ;;  %2148 = vmatprep.mubr.f32.mxu0 %v2503_v49 }
 0x2d1   : > { %2149 = vmatmul.mubr.f32.gmra.mrb[26].mxu0 %v2505_v50 }
 0x2d2   : > { %2364 = vmatpush3.bf16.msra.mxu0 %v2361_v2  ;;  %2336 = vmatpush1.bf16.msra.mxu1 %v2335_v6  ;;  %v1239_v6 = vsub.s32 0, %v1238_v9 }
 0x2d3   : > { %v2507_v51 = vpop.eup %2506  ;;  %2366 = vmatprep.subr.bf16.mxu0 %v2365_v11  ;;  %2338 = vmatprep.subr.bf16.mxu1 %v2337_v14 }
 0x2d4   : > { %v2509_v52 = vpop.eup %2508  ;;  %2151 = vmatprep.mubr.f32.mxu0 %v2507_v51  ;;  %v3233_v13 = vrot.slane %v1235_v10, %v1239_v6 }
 0x2d5   : > { %2152 = vmatmul.mubr.f32.gmra.mrb[28].mxu0 %v2509_v52 }
 0x2d6   : > { %2368 = vmatpush3.bf16.msra.mxu0 %v2365_v11  ;;  %2340 = vmatpush1.bf16.msra.mxu1 %v2339_v18  ;;  %v1243_v11 = vsub.s32 1, %v1238_v9 }
 0x2d7   : > { %v2511_v53 = vpop.eup %2510  ;;  %2370 = vmatprep.subr.bf16.mxu0 %v2369_v20 }
 0x2d8   : > { %v2513_v54 = vpop.eup %2512  ;;  %2154 = vmatprep.mubr.f32.mxu0 %v2511_v53  ;;  %v3235_v14 = vrot.slane %v1235_v10, %v1243_v11 }
 0x2d9   : > { %2155 = vmatmul.mubr.f32.gmra.mrb[30].mxu0 %v2513_v54 }
 0x2da   : > { %2372 = vmatpush3.bf16.msra.mxu0 %v2369_v20 }
 0x390   : > { %v2135_v23 = vpop.f32.mrb[16].mxu0 }
 0x391   : > { %v1098_v24 = vadd.f32 %v2135_v23, %v3197_v22  ;;  %v1092_v25 = vpop.f32.mrb[17].mxu0 }
 0x392   : > { %v1093_v26 = vadd.f32 %v3197_v22, %v1092_v25 }
 0x394   : > { %2514 = vtanh.f32 %v1093_v26  ;;  %v2138_v27 = vpop.f32.mrb[18].mxu0 }
 0x395   : > { %2516 = vtanh.f32 %v1098_v24  ;;  %v1108_v28 = vadd.f32 %v2138_v27, %v3197_v22  ;;  %v1102_v29 = vpop.f32.mrb[19].mxu0 }
 0x396   : > { %v1103_v30 = vadd.f32 %v3197_v22, %v1102_v29 }
 0x398   : > { %2518 = vtanh.f32 %v1103_v30  ;;  %v2141_v31 = vpop.f32.mrb[20].mxu0  ;;  %v1606_v30 = vld [vmem:[%s3418_s11] sm:$0x7] }
 0x399   : > { %2520 = vtanh.f32 %v1108_v28  ;;  %v1118_v32 = vadd.f32 %v2141_v31, %v3197_v22  ;;  %v1112_v33 = vpop.f32.mrb[21].mxu0 }
 0x39a   : > { %v1113_v34 = vadd.f32 %v3197_v22, %v1112_v33 }
 0x39c   : > { %2522 = vtanh.f32 %v1113_v34  ;;  %v2144_v35 = vpop.f32.mrb[22].mxu0 }
 0x39d   : > { %2524 = vtanh.f32 %v1118_v32  ;;  %v1128_v36 = vadd.f32 %v2144_v35, %v3197_v22  ;;  %v1122_v37 = vpop.f32.mrb[23].mxu0 }
 0x39e   : > { %v2515_v38 = vpop.eup %2514  ;;  %v1123_v39 = vadd.f32 %v3197_v22, %v1122_v37 }
 0x39f   : > { %v2517_v40 = vpop.eup %2516  ;;  %1317 = vmatmul.mubr.f32.vlgmr.msra.gmra.mrb[16].mxu1 %v2515_v38  ;;  %2189 = vmatprep.mubr.f32.mxu0 %v2515_v38 }
 0x3a0   : > { %2526 = vtanh.f32 %v1123_v39  ;;  %v2147_v41 = vpop.f32.mrb[24].mxu0  ;;  %2190 = vmatmul.mubr.f32.vlgmr.msra.gmra.mrb[32].mxu0 %v2517_v40  ;;  %1322 = vmatprep.mubr.f32.mxu1 %v2748_v21 }
 0x3a1   : > { %2528 = vtanh.f32 %v1128_v36  ;;  %v1138_v42 = vadd.f32 %v2147_v41, %v3197_v22  ;;  %v1132_v43 = vpop.f32.mrb[25].mxu0  ;;  %v3250_v36 = vrot.slane %v1606_v30, %v1239_v6 }
 0x3a2   : > { %v2519_v44 = vpop.eup %2518  ;;  %v1133_v45 = vadd.f32 %v3197_v22, %v1132_v43 }
 0x3a3   : > { %v2521_v46 = vpop.eup %2520  ;;  %1323 = vmatmul.mubr.f32.gmra.mrb[18].mxu1 %v2517_v40  ;;  %2192 = vmatprep.mubr.f32.mxu0 %v2519_v44  ;;  %v3254_v40 = vrot.slane %v1606_v30, %v1243_v11 }
 0x3a4   : > { %2530 = vtanh.f32 %v1133_v45  ;;  %v2150_v47 = vpop.f32.mrb[26].mxu0  ;;  %2193 = vmatmul.mubr.f32.gmra.mrb[34].mxu0 %v2521_v46  ;;  %1328 = vmatprep.mubr.f32.mxu1 %v2748_v21 }
 0x3a5   : > { %2532 = vtanh.f32 %v1138_v42  ;;  %v1148_v48 = vadd.f32 %v2150_v47, %v3197_v22  ;;  %v1142_v49 = vpop.f32.mrb[27].mxu0 }
 0x3a6   : > { %v2523_v50 = vpop.eup %2522  ;;  %v1143_v51 = vadd.f32 %v3197_v22, %v1142_v49 }
 0x3a7   : > { %v2525_v52 = vpop.eup %2524  ;;  %1329 = vmatmul.mubr.f32.gmra.mrb[20].mxu1 %v2519_v44  ;;  %2195 = vmatprep.mubr.f32.mxu0 %v2523_v50 }
 0x3a8   : > { %2534 = vtanh.f32 %v1143_v51  ;;  %v2153_v53 = vpop.f32.mrb[28].mxu0  ;;  %2196 = vmatmul.mubr.f32.gmra.mrb[36].mxu0 %v2525_v52  ;;  %1334 = vmatprep.mubr.f32.mxu1 %v2748_v21 }
 0x3a9   : > { %2536 = vtanh.f32 %v1148_v48  ;;  %v1158_v54 = vadd.f32 %v2153_v53, %v3197_v22  ;;  %v1152_v55 = vpop.f32.mrb[29].mxu0 }
 0x3aa   : > { %v2527_v56 = vpop.eup %2526  ;;  %v1153_v57 = vadd.f32 %v3197_v22, %v1152_v55 }
 0x3ab   : > { %v2529_v58 = vpop.eup %2528  ;;  %1335 = vmatmul.mubr.f32.gmra.mrb[22].mxu1 %v2521_v46  ;;  %2198 = vmatprep.mubr.f32.mxu0 %v2527_v56  ;;  %v3257_v46 = vrot.slane %v1606_v30, %v1247_v12 }
 0x3ac   : > { %2538 = vtanh.f32 %v1153_v57  ;;  %v2156_v59 = vpop.f32.mrb[30].mxu0  ;;  %2199 = vmatmul.mubr.f32.gmra.mrb[38].mxu0 %v2529_v58  ;;  %1340 = vmatprep.mubr.f32.mxu1 %v2748_v21 }
 0x3ad   : > { %2540 = vtanh.f32 %v1158_v54  ;;  %v1168_v60 = vadd.f32 %v2156_v59, %v3197_v22  ;;  %v1162_v61 = vpop.f32.mrb[31].mxu0 }
 0x3ae   : > { %v2531_v62 = vpop.eup %2530  ;;  %v1163_v63 = vadd.f32 %v3197_v22, %v1162_v61 }
 0x3af   : > { %v2533_v0 = vpop.eup %2532  ;;  %1341 = vmatmul.mubr.f32.gmra.mrb[24].mxu1 %v2523_v50  ;;  %2201 = vmatprep.mubr.f32.mxu0 %v2531_v62 }
 0x3b0   : > { %2542 = vtanh.f32 %v1163_v63  ;;  %2202 = vmatmul.mubr.f32.gmra.mrb[40].mxu0 %v2533_v0  ;;  %1346 = vmatprep.mubr.f32.mxu1 %v2748_v21 }
 0x3b1   : > { %2544 = vtanh.f32 %v1168_v60 }
 0x3b2   : > { %v2535_v1 = vpop.eup %2534 }
 0x3b3   : > { %v2537_v2 = vpop.eup %2536  ;;  %1347 = vmatmul.mubr.f32.gmra.mrb[26].mxu1 %v2525_v52  ;;  %2204 = vmatprep.mubr.f32.mxu0 %v2535_v1 }
 0x3b4   : > { %2205 = vmatmul.mubr.f32.gmra.mrb[42].mxu0 %v2537_v2  ;;  %1352 = vmatprep.mubr.f32.mxu1 %v2748_v21 }
 0x3b6   : > { %v2539_v3 = vpop.eup %2538 }
 0x3b7   : > { %v2541_v4 = vpop.eup %2540  ;;  %1353 = vmatmul.mubr.f32.gmra.mrb[28].mxu1 %v2527_v56  ;;  %2207 = vmatprep.mubr.f32.mxu0 %v2539_v3 }
 0x3b8   : > { %2208 = vmatmul.mubr.f32.gmra.mrb[44].mxu0 %v2541_v4  ;;  %1358 = vmatprep.mubr.f32.mxu1 %v2748_v21 }
 0x3ba   : > { %v2543_v5 = vpop.eup %2542 }
 0x3bb   : > { %v2545_v7 = vpop.eup %2544  ;;  %1359 = vmatmul.mubr.f32.gmra.mrb[30].mxu1 %v2529_v58  ;;  %2210 = vmatprep.mubr.f32.mxu0 %v2543_v5 }
 0x3bc   : > { %2211 = vmatmul.mubr.f32.gmra.mrb[46].mxu0 %v2545_v7  ;;  %1364 = vmatprep.mubr.f32.mxu1 %v2748_v21 }
 0x3bf   : > { %1365 = vmatmul.mubr.f32.gmra.mrb[32].mxu1 %v2531_v62 }
 0x3c0   : > { %1370 = vmatprep.mubr.f32.mxu1 %v2748_v21 }
 0x3c3   : > { %1371 = vmatmul.mubr.f32.gmra.mrb[34].mxu1 %v2533_v0 }
 0x3c4   : > { %1376 = vmatprep.mubr.f32.mxu1 %v2748_v21 }
 0x3c7   : > { %1377 = vmatmul.mubr.f32.gmra.mrb[36].mxu1 %v2535_v1 }
 0x3c8   : > { %1382 = vmatprep.mubr.f32.mxu1 %v2748_v21 }
 0x3cb   : > { %1383 = vmatmul.mubr.f32.gmra.mrb[38].mxu1 %v2537_v2 }
 0x3cc   : > { %1388 = vmatprep.mubr.f32.mxu1 %v2748_v21 }
 0x3cf   : > { %1389 = vmatmul.mubr.f32.gmra.mrb[40].mxu1 %v2539_v3 }
 0x3d0   : > { %1394 = vmatprep.mubr.f32.mxu1 %v2748_v21 }
 0x3d3   : > { %1395 = vmatmul.mubr.f32.gmra.mrb[42].mxu1 %v2541_v4 }
 0x3d4   : > { %1400 = vmatprep.mubr.f32.mxu1 %v2748_v21 }
 0x3d7   : > { %1401 = vmatmul.mubr.f32.gmra.mrb[44].mxu1 %v2543_v5 }
 0x3d8   : > { %1406 = vmatprep.mubr.f32.mxu1 %v2748_v21 }
 0x3db   : > { %1407 = vmatmul.mubr.f32.gmra.mrb[46].mxu1 %v2545_v7 }
 0x472   : > { %v1318_v16 = vpop.f32.mrb[16].mxu1 }
 0x473   : > { %v1319_v17 = vadd.f32 %v1318_v16, %v3233_v13  ;;  %v1320_v18 = vpop.f32.mrb[17].mxu1  ;;  %v2191_v19 = vpop.f32.mrb[32].mxu0 }
 0x474   : > { %v1321_v20 = vadd.f32 %v1320_v18, %v3235_v14  ;;  %v1485_v21 = vadd.f32 %v2191_v19, %v3237_v15  ;;  %v1479_v22 = vpop.f32.mrb[33].mxu0 }
 0x475   : > { %2546 = vtanh.f32 %v1319_v17  ;;  %v1480_v23 = vadd.f32 %v1479_v22, %v3237_v15 }
 0x476   : > { %2548 = vtanh.f32 %v1321_v20  ;;  %v1324_v24 = vpop.f32.mrb[18].mxu1 }
 0x477   : > { %2550 = vtanh.f32 %v1485_v21  ;;  %v1325_v25 = vadd.f32 %v1324_v24, %v3233_v13  ;;  %v1326_v26 = vpop.f32.mrb[19].mxu1  ;;  %v2194_v27 = vpop.f32.mrb[34].mxu0 }
 0x478   : > { %2552 = vtanh.f32 %v1480_v23  ;;  %v1327_v28 = vadd.f32 %v1326_v26, %v3235_v14  ;;  %v1489_v29 = vpop.f32.mrb[35].mxu0  ;;  %v1495_v37 = vadd.f32 %v2194_v27, %v3237_v15 }
 0x479   : > { %2554 = vtanh.f32 %v1325_v25  ;;  %v1490_v31 = vadd.f32 %v1489_v29, %v3237_v15 }
 0x47a   : > { %2556 = vtanh.f32 %v1327_v28  ;;  %v1330_v32 = vpop.f32.mrb[20].mxu1 }
 0x47b   : > { %v1331_v33 = vadd.f32 %v1330_v32, %v3233_v13  ;;  %v1332_v34 = vpop.f32.mrb[21].mxu1  ;;  %v2197_v35 = vpop.f32.mrb[36].mxu0  ;;  %2558 = vtanh.f32 %v1490_v31 }
 0x47c   : > { %v1333_v38 = vadd.f32 %v1332_v34, %v3235_v14  ;;  %v1499_v39 = vpop.f32.mrb[37].mxu0  ;;  %v1505_v63 = vadd.f32 %v2197_v35, %v3237_v15 }
 0x47d   : > { %2560 = vtanh.f32 %v1331_v33  ;;  %v1500_v48 = vadd.f32 %v1499_v39, %v3237_v15 }
 0x47e   : > { %2562 = vtanh.f32 %v1333_v38  ;;  %v1336_v41 = vpop.f32.mrb[22].mxu1 }
 0x47f   : > { %v2547_v42 = vpop.eup %2546  ;;  %v1337_v43 = vadd.f32 %v1336_v41, %v3233_v13  ;;  %v1338_v44 = vpop.f32.mrb[23].mxu1  ;;  %2564 = vtanh.f32 %v1495_v37 }
 0x480   : > { %v2200_v45 = vpop.f32.mrb[38].mxu0  ;;  %v2549_v47 = vpop.eup %2548  ;;  %v1339_v49 = vadd.f32 %v1338_v44, %v3235_v14  ;;  %v1623_v51 = vmul.f32 %v2547_v42, %v3250_v36 }
 0x481   : > { %v1509_v50 = vpop.f32.mrb[39].mxu0  ;;  %v2551_v52 = vpop.eup %2550  ;;  %2566 = vtanh.f32 %v1337_v43  ;;  %v1624_v53 = vmul.f32 %v2549_v47, %v3254_v40  ;;  %v1515_v32 = vadd.f32 %v2200_v45, %v3237_v15 }
 0x482   : > { %v2553_v54 = vpop.eup %2552  ;;  %2568 = vtanh.f32 %v1339_v49  ;;  %v1342_v55 = vpop.f32.mrb[24].mxu1  ;;  %v1628_v11 = vmul.f32 %v2551_v52, %v3257_v46  ;;  %v1510_v17 = vadd.f32 %v1509_v50, %v3237_v15 }
 0x483   : > { %v2555_v56 = vpop.eup %2554  ;;  %v1343_v57 = vadd.f32 %v1342_v55, %v3233_v13  ;;  %v1344_v58 = vpop.f32.mrb[25].mxu1  ;;  %v1625_v60 = vmul.f32 %v2553_v54, %v3257_v46  ;;  %v1671_v61 = vadd.f32 %v1624_v53, %v1623_v51  ;;  %2570 = vtanh.f32 %v1500_v48 }
 0x484   : > { %v3264_v59 = vpop.f32.mrb[40].mxu0  ;;  %v2557_v62 = vpop.eup %2556  ;;  %v1345_v0 = vadd.f32 %v1344_v58, %v3235_v14  ;;  %v1626_v2 = vmul.f32 %v2555_v56, %v3250_v36 }
 0x485   : > { %v1519_v1 = vpop.f32.mrb[41].mxu0  ;;  %2572 = vtanh.f32 %v1343_v57  ;;  %v1672_v3 = vadd.f32 %v1671_v61, %v1625_v60  ;;  %v1627_v4 = vmul.f32 %v2557_v62, %v3254_v40  ;;  %v2559_v5 = vpop.eup %2558 }
 0x486   : > { %2574 = vtanh.f32 %v1345_v0  ;;  %v1348_v7 = vpop.f32.mrb[26].mxu1  ;;  %v1631_v29 = vmul.f32 %v2559_v5, %v3257_v46  ;;  %v1520_v50 = vadd.f32 %v1519_v1, %v3237_v15  ;;  %v1525_v1 = vadd.f32 %v3264_v59, %v3237_v15 }
 0x487   : > { %v2561_v8 = vpop.eup %2560  ;;  %v1349_v9 = vadd.f32 %v1348_v7, %v3233_v13  ;;  %v1350_v6 = vpop.f32.mrb[27].mxu1  ;;  %1673 = vadd.xlane.f32.xlu0 %v1672_v3  ;;  %v1675_v12 = vadd.f32 %v1627_v4, %v1626_v2  ;;  %2576 = vtanh.f32 %v1505_v63 }
 0x488   : > { %v3272_v10 = vpop.f32.mrb[42].mxu0  ;;  %v2563_v16 = vpop.eup %2562  ;;  %v1351_v18 = vadd.f32 %v1350_v6, %v3235_v14  ;;  %v1629_v20 = vmul.f32 %v2561_v8, %v3250_v36 }
 0x489   : > { %v3277_v19 = vpop.f32.mrb[43].mxu0  ;;  %2578 = vtanh.f32 %v1349_v9  ;;  %v1676_v21 = vadd.f32 %v1675_v12, %v1628_v11  ;;  %v1630_v22 = vmul.f32 %v2563_v16, %v3254_v40  ;;  %v2565_v23 = vpop.eup %2564 }
 0x48a   : > { %2580 = vtanh.f32 %v1351_v18  ;;  %v1354_v24 = vpop.f32.mrb[28].mxu1  ;;  %v1634_v47 = vmul.f32 %v2565_v23, %v3257_v46 }
 0x48b   : > { %v2567_v25 = vpop.eup %2566  ;;  %v1355_v26 = vadd.f32 %v1354_v24, %v3233_v13  ;;  %v1356_v27 = vpop.f32.mrb[29].mxu1  ;;  %1677 = vadd.xlane.f32.xlu1 %v1676_v21  ;;  %v1679_v30 = vadd.f32 %v1630_v22, %v1629_v20  ;;  %2582 = vtanh.f32 %v1510_v17  ;;  %v1530_v17 = vadd.f32 %v3277_v19, %v3237_v15 }
 0x48c   : > { %v3282_v28 = vpop.f32.mrb[44].mxu0  ;;  %v2569_v31 = vpop.eup %2568  ;;  %v1357_v33 = vadd.f32 %v1356_v27, %v3235_v14  ;;  %v1632_v35 = vmul.f32 %v2567_v25, %v3250_v36 }
 0x48d   : > { %v3287_v34 = vpop.f32.mrb[45].mxu0  ;;  %2584 = vtanh.f32 %v1355_v26  ;;  %v1680_v37 = vadd.f32 %v1679_v30, %v1631_v29  ;;  %v1633_v38 = vmul.f32 %v2569_v31, %v3254_v40  ;;  %v2571_v39 = vpop.eup %2570  ;;  %v1535_v31 = vadd.f32 %v3272_v10, %v3237_v15 }
 0x48e   : > { %2586 = vtanh.f32 %v1357_v33  ;;  %v1360_v41 = vpop.f32.mrb[30].mxu1  ;;  %v1637_v62 = vmul.f32 %v2571_v39, %v3257_v46 }
 0x48f   : > { %v2573_v42 = vpop.eup %2572  ;;  %v1361_v43 = vadd.f32 %v1360_v41, %v3233_v13  ;;  %v1362_v44 = vpop.f32.mrb[31].mxu1  ;;  %1681 = vadd.xlane.f32.xlu0 %v1680_v37  ;;  %v1683_v48 = vadd.f32 %v1633_v38, %v1632_v35  ;;  %2588 = vtanh.f32 %v1515_v32 }
 0x490   : > { %v3292_v45 = vpop.f32.mrb[46].mxu0  ;;  %v2575_v49 = vpop.eup %2574  ;;  %v1363_v51 = vadd.f32 %v1362_v44, %v3235_v14  ;;  %v1635_v53 = vmul.f32 %v2573_v42, %v3250_v36 }
 0x491   : > { %v3297_v52 = vpop.f32.mrb[47].mxu0  ;;  %2590 = vtanh.f32 %v1361_v43  ;;  %v1684_v54 = vadd.f32 %v1683_v48, %v1634_v47  ;;  %v1636_v55 = vmul.f32 %v2575_v49, %v3254_v40  ;;  %v2577_v56 = vpop.eup %2576  ;;  %v1540_v48 = vadd.f32 %v3287_v34, %v3237_v15 }
 0x492   : > { %2592 = vtanh.f32 %v1363_v51  ;;  %v1366_v57 = vpop.f32.mrb[32].mxu1  ;;  %v1640_v12 = vmul.f32 %v2577_v56, %v3257_v46 }
 0x493   : > { %v2579_v58 = vpop.eup %2578  ;;  %v1367_v60 = vadd.f32 %v1366_v57, %v3233_v13  ;;  %v1368_v61 = vpop.f32.mrb[33].mxu1  ;;  %1685 = vadd.xlane.f32.xlu0 %v1684_v54  ;;  %v1687_v63 = vadd.f32 %v1636_v55, %v1635_v53  ;;  %2594 = vtanh.f32 %v1520_v50 }
 0x494   : > { %v2581_v0 = vpop.eup %2580  ;;  %v1369_v2 = vadd.f32 %v1368_v61, %v3235_v14  ;;  %v1638_v3 = vmul.f32 %v2579_v58, %v3250_v36 }
 0x495   : > { %2596 = vtanh.f32 %v1367_v60  ;;  %v1688_v4 = vadd.f32 %v1687_v63, %v1637_v62  ;;  %v1639_v5 = vmul.f32 %v2581_v0, %v3254_v40  ;;  %v2583_v7 = vpop.eup %2582  ;;  %v1545_v62 = vadd.f32 %v3282_v28, %v3237_v15 }
 0x496   : > { %2598 = vtanh.f32 %v1369_v2  ;;  %v1372_v8 = vpop.f32.mrb[34].mxu1  ;;  %v1643_v29 = vmul.f32 %v2583_v7, %v3257_v46 }
 0x497   : > { %v2585_v9 = vpop.eup %2584  ;;  %v1373_v6 = vadd.f32 %v1372_v8, %v3233_v13  ;;  %v1374_v11 = vpop.f32.mrb[35].mxu1  ;;  %1689 = vadd.xlane.f32.xlu1 %v1688_v4  ;;  %v1691_v59 = vadd.f32 %v1639_v5, %v1638_v3  ;;  %2600 = vtanh.f32 %v1525_v1 }
 0x498   : > { %v2587_v16 = vpop.eup %2586  ;;  %v1375_v18 = vadd.f32 %v1374_v11, %v3235_v14  ;;  %v1641_v20 = vmul.f32 %v2585_v9, %v3250_v36  ;;  %v1550_v11 = vadd.f32 %v3297_v52, %v3237_v15 }
 0x499   : > { %2602 = vtanh.f32 %v1373_v6  ;;  %v1692_v21 = vadd.f32 %v1691_v59, %v1640_v12  ;;  %v1642_v22 = vmul.f32 %v2587_v16, %v3254_v40  ;;  %v2589_v23 = vpop.eup %2588 }
 0x49a   : > { %2604 = vtanh.f32 %v1375_v18  ;;  %v1378_v24 = vpop.f32.mrb[36].mxu1  ;;  %v1646_v44 = vmul.f32 %v2589_v23, %v3257_v46 }
 0x49b   : > { %v2591_v25 = vpop.eup %2590  ;;  %v1379_v26 = vadd.f32 %v1378_v24, %v3233_v13  ;;  %v1380_v27 = vpop.f32.mrb[37].mxu1  ;;  %1693 = vadd.xlane.f32.xlu0 %v1692_v21  ;;  %v1695_v30 = vadd.f32 %v1642_v22, %v1641_v20  ;;  %2606 = vtanh.f32 %v1530_v17 }
 0x49c   : > { %v2593_v19 = vpop.eup %2592  ;;  %v1381_v32 = vadd.f32 %v1380_v27, %v3235_v14  ;;  %v1644_v33 = vmul.f32 %v2591_v25, %v3250_v36 }
 0x49d   : > { %2608 = vtanh.f32 %v1379_v26  ;;  %v1696_v35 = vadd.f32 %v1695_v30, %v1643_v29  ;;  %v1645_v37 = vmul.f32 %v2593_v19, %v3254_v40  ;;  %v2595_v38 = vpop.eup %2594  ;;  %v1555_v26 = vadd.f32 %v3292_v45, %v3237_v15 }
 0x49e   : > { %2610 = vtanh.f32 %v1381_v32  ;;  %v1384_v39 = vpop.f32.mrb[38].mxu1  ;;  %v1649_v60 = vmul.f32 %v2595_v38, %v3257_v46 }
 0x49f   : > { %v2597_v41 = vpop.eup %2596  ;;  %v1385_v42 = vadd.f32 %v1384_v39, %v3233_v13  ;;  %v1386_v43 = vpop.f32.mrb[39].mxu1  ;;  %1697 = vadd.xlane.f32.xlu1 %v1696_v35  ;;  %v1699_v10 = vadd.f32 %v1645_v37, %v1644_v33  ;;  %2612 = vtanh.f32 %v1535_v31 }
 0x4a0   : > { %v2599_v47 = vpop.eup %2598  ;;  %v1387_v49 = vadd.f32 %v1386_v43, %v3235_v14  ;;  %v1647_v50 = vmul.f32 %v2597_v41, %v3250_v36 }
 0x4a1   : > { %2614 = vtanh.f32 %v1385_v42  ;;  %v1700_v51 = vadd.f32 %v1699_v10, %v1646_v44  ;;  %v1648_v53 = vmul.f32 %v2599_v47, %v3254_v40  ;;  %v2601_v54 = vpop.eup %2600 }
 0x4a2   : > { %2616 = vtanh.f32 %v1387_v49  ;;  %v1390_v55 = vpop.f32.mrb[40].mxu1  ;;  %v1652_v9 = vmul.f32 %v2601_v54, %v3257_v46 }
 0x4a3   : > { %v2603_v56 = vpop.eup %2602  ;;  %v1391_v57 = vadd.f32 %v1390_v55, %v3233_v13  ;;  %v1392_v58 = vpop.f32.mrb[41].mxu1  ;;  %1701 = vadd.xlane.f32.xlu0 %v1700_v51  ;;  %v1703_v61 = vadd.f32 %v1648_v53, %v1647_v50  ;;  %2618 = vtanh.f32 %v1540_v48 }
 0x4a4   : > { %v2605_v34 = vpop.eup %2604  ;;  %v1393_v63 = vadd.f32 %v1392_v58, %v3235_v14  ;;  %v1650_v0 = vmul.f32 %v2603_v56, %v3250_v36 }
 0x4a5   : > { %2620 = vtanh.f32 %v1391_v57  ;;  %v1704_v1 = vadd.f32 %v1703_v61, %v1649_v60  ;;  %v1651_v2 = vmul.f32 %v2605_v34, %v3254_v40  ;;  %v2607_v3 = vpop.eup %2606 }
 0x4a6   : > { %2622 = vtanh.f32 %v1393_v63  ;;  %v1396_v4 = vpop.f32.mrb[42].mxu1  ;;  %v1655_v24 = vmul.f32 %v2607_v3, %v3257_v46 }
 0x4a7   : > { %v2609_v5 = vpop.eup %2608  ;;  %v1397_v7 = vadd.f32 %v1396_v4, %v3233_v13  ;;  %v1398_v8 = vpop.f32.mrb[43].mxu1  ;;  %1705 = vadd.xlane.f32.xlu1 %v1704_v1  ;;  %v1707_v28 = vadd.f32 %v1651_v2, %v1650_v0  ;;  %2624 = vtanh.f32 %v1545_v62 }
 0x4a8   : > { %v2611_v6 = vpop.eup %2610  ;;  %v1399_v12 = vadd.f32 %v1398_v8, %v3235_v14  ;;  %v1653_v59 = vmul.f32 %v2609_v5, %v3250_v36 }
 0x4a9   : > { %2626 = vtanh.f32 %v1397_v7  ;;  %v1708_v16 = vadd.f32 %v1707_v28, %v1652_v9  ;;  %v1654_v17 = vmul.f32 %v2611_v6, %v3254_v40  ;;  %v2613_v18 = vpop.eup %2612 }
 0x4aa   : > { %2628 = vtanh.f32 %v1399_v12  ;;  %v1402_v20 = vpop.f32.mrb[44].mxu1  ;;  %v1658_v38 = vmul.f32 %v2613_v18, %v3257_v46 }
 0x4ab   : > { %v2615_v21 = vpop.eup %2614  ;;  %v1403_v22 = vadd.f32 %v1402_v20, %v3233_v13  ;;  %1709 = vadd.xlane.f32.xlu0 %v1708_v16  ;;  %v1404_v23 = vpop.f32.mrb[45].mxu1  ;;  %v1711_v25 = vadd.f32 %v1654_v17, %v1653_v59  ;;  %2630 = vtanh.f32 %v1550_v11 }
 0x4ac   : > { %v2617_v52 = vpop.eup %2616  ;;  %v1405_v27 = vadd.f32 %v1404_v23, %v3235_v14  ;;  %v1656_v29 = vmul.f32 %v2615_v21, %v3250_v36 }
 0x4ad   : > { %2632 = vtanh.f32 %v1403_v22  ;;  %v1712_v30 = vadd.f32 %v1711_v25, %v1655_v24  ;;  %v1657_v19 = vmul.f32 %v2617_v52, %v3254_v40  ;;  %v2619_v31 = vpop.eup %2618 }
 0x4ae   : > { %2634 = vtanh.f32 %v1405_v27  ;;  %v1408_v32 = vpop.f32.mrb[46].mxu1 }
 0x4af   : > { %v2621_v33 = vpop.eup %2620  ;;  %v1409_v35 = vadd.f32 %v1408_v32, %v3233_v13  ;;  %1713 = vadd.xlane.f32.xlu1 %v1712_v30  ;;  %v1410_v37 = vpop.f32.mrb[47].mxu1  ;;  %v1715_v15 = vadd.f32 %v1657_v19, %v1656_v29  ;;  %2636 = vtanh.f32 %v1555_v26  ;;  %v1661_v13 = vmul.f32 %v2619_v31, %v3257_v46 }
 0x4b0   : > { %v2623_v45 = vpop.eup %2622  ;;  %v1411_v39 = vadd.f32 %v1410_v37, %v3235_v14  ;;  %v1659_v41 = vmul.f32 %v2621_v33, %v3250_v36 }
 0x4b1   : > { %2638 = vtanh.f32 %v1409_v35  ;;  %v1716_v42 = vadd.f32 %v1715_v15, %v1658_v38  ;;  %v1660_v43 = vmul.f32 %v2623_v45, %v3254_v40  ;;  %v2625_v44 = vpop.eup %2624 }
 0x4b2   : > { %2640 = vtanh.f32 %v1411_v39  ;;  %v1664_v54 = vmul.f32 %v2625_v44, %v3257_v46 }
 0x4b3   : > { %v2627_v10 = vpop.eup %2626  ;;  %1717 = vadd.xlane.f32.xlu0 %v1716_v42  ;;  %v1719_v47 = vadd.f32 %v1660_v43, %v1659_v41 }
 0x4b4   : > { %v2629_v48 = vpop.eup %2628  ;;  %v1662_v49 = vmul.f32 %v2627_v10, %v3250_v36 }
 0x4b5   : > { %v1720_v50 = vadd.f32 %v1719_v47, %v1661_v13  ;;  %v1663_v51 = vmul.f32 %v2629_v48, %v3254_v40  ;;  %v2631_v14 = vpop.eup %2630 }
 0x4b6   : > { %v1667_v62 = vmul.f32 %v2631_v14, %v3257_v46 }
 0x4b7   : > { %v2633_v53 = vpop.eup %2632  ;;  %1721 = vadd.xlane.f32.xlu1 %v1720_v50  ;;  %v1723_v55 = vadd.f32 %v1663_v51, %v1662_v49 }
 0x4b8   : > { %v2635_v56 = vpop.eup %2634  ;;  %v1665_v57 = vmul.f32 %v2633_v53, %v3250_v36 }
 0x4b9   : > { %v1724_v58 = vadd.f32 %v1723_v55, %v1664_v54  ;;  %v1666_v60 = vmul.f32 %v2635_v56, %v3254_v40  ;;  %v2637_v61 = vpop.eup %2636 }
 0x4ba   : > { %v1670_v4 = vmul.f32 %v2637_v61, %v3257_v46 }
 0x4bb   : > { %v2639_v34 = vpop.eup %2638  ;;  %1725 = vadd.xlane.f32.xlu0 %v1724_v58  ;;  %v1727_v63 = vadd.f32 %v1666_v60, %v1665_v57 }
 0x4bc   : > { %v2641_v0 = vpop.eup %2640  ;;  %v1668_v1 = vmul.f32 %v2639_v34, %v3250_v36 }
 0x4bd   : > { %v1728_v2 = vadd.f32 %v1727_v63, %v1667_v62  ;;  %v1669_v3 = vmul.f32 %v2641_v0, %v3254_v40 }
 0x4bf   : > { %1729 = vadd.xlane.f32.xlu1 %v1728_v2  ;;  %v1731_v5 = vadd.f32 %v1669_v3, %v1668_v1 }
 0x4c1   : > { %v1732_v7 = vadd.f32 %v1731_v5, %v1670_v4 }
 0x4c3   : > { %1733 = vadd.xlane.f32.xlu0 %v1732_v7 }
 0x514   : > { %v1674_v36 = vpop.xlane.xlu0 %1673 }
 0x515   : > { %1736 = vst.msk [vmem:[%s3370_s22] sm:$0xff] %vm1735_vm0, %v1674_v36 }
 0x518   : > { %v1678_v40 = vpop.xlane.xlu1 %1677 }
 0x519   : > { %1737 = vst.msk [vmem:[%s3370_s22 + $0x8] sm:$0xff] %vm1735_vm0, %v1678_v40 }
 0x51c   : > { %v1682_v46 = vpop.xlane.xlu0 %1681 }
 0x51d   : > { %1738 = vst.msk [vmem:[%s3370_s22 + $0x10] sm:$0xff] %vm1735_vm0, %v1682_v46 }
 0x520   : > { %v1686_v8 = vpop.xlane.xlu0 %1685 }
 0x521   : > { %1739 = vst.msk [vmem:[%s3370_s22 + $0x18] sm:$0xff] %vm1735_vm0, %v1686_v8 }
 0x524   : > { %v1690_v9 = vpop.xlane.xlu1 %1689 }
 0x525   : > { %1740 = vst.msk [vmem:[%s3370_s22 + $0x20] sm:$0xff] %vm1735_vm0, %v1690_v9 }
 0x528   : > { %v1694_v28 = vpop.xlane.xlu0 %1693 }
 0x529   : > { %1741 = vst.msk [vmem:[%s3370_s22 + $0x28] sm:$0xff] %vm1735_vm0, %v1694_v28 }
 0x52c   : > { %v1698_v6 = vpop.xlane.xlu1 %1697 }
 0x52d   : > { %1742 = vst.msk [vmem:[%s3370_s22 + $0x30] sm:$0xff] %vm1735_vm0, %v1698_v6 }
 0x530   : > { %v1702_v11 = vpop.xlane.xlu0 %1701 }
 0x531   : > { %1743 = vst.msk [vmem:[%s3370_s22 + $0x38] sm:$0xff] %vm1735_vm0, %v1702_v11 }
 0x534   : > { %v1706_v12 = vpop.xlane.xlu1 %1705 }
 0x535   : > { %1744 = vst.msk [vmem:[%s3370_s22 + $0x40] sm:$0xff] %vm1735_vm0, %v1706_v12 }
 0x538   : > { %v1710_v59 = vpop.xlane.xlu0 %1709 }
 0x539   : > { %1745 = vst.msk [vmem:[%s3370_s22 + $0x48] sm:$0xff] %vm1735_vm0, %v1710_v59 }
 0x53c   : > { %v1714_v16 = vpop.xlane.xlu1 %1713 }
 0x53d   : > { %1746 = vst.msk [vmem:[%s3370_s22 + $0x50] sm:$0xff] %vm1735_vm0, %v1714_v16 }
 0x540   : > { %v1718_v17 = vpop.xlane.xlu0 %1717 }
 0x541   : > { %1747 = vst.msk [vmem:[%s3370_s22 + $0x58] sm:$0xff] %vm1735_vm0, %v1718_v17 }
 0x544   : > { %v1722_v18 = vpop.xlane.xlu1 %1721 }
 0x545   : > { %1748 = vst.msk [vmem:[%s3370_s22 + $0x60] sm:$0xff] %vm1735_vm0, %v1722_v18 }
 0x548   : > { %v1726_v20 = vpop.xlane.xlu0 %1725 }
 0x549   : > { %1749 = vst.msk [vmem:[%s3370_s22 + $0x68] sm:$0xff] %vm1735_vm0, %v1726_v20 }
 0x54c   : > { %v1730_v21 = vpop.xlane.xlu1 %1729 }
 0x54d   : > { %1750 = vst.msk [vmem:[%s3370_s22 + $0x70] sm:$0xff] %vm1735_vm0, %v1730_v21 }
 0x550   : > { %v1734_v22 = vpop.xlane.xlu0 %1733 }
 0x551   : > { %1751 = vst.msk [vmem:[%s3370_s22 + $0x78] sm:$0xff] %vm1735_vm0, %v1734_v22 }
 0x552 PF: > { %s24_s21 = sadd.s32 1, %s2740_s21  }
 0x553   : > { %p21_p3 = scmp.ge.s32.totalorder %s24_s21, 5  }
 0x555   :  { %23 = sbr.rel (!%p21_p3) target bundleno = 4 (0x4), region = 111 }
 0x55c   :  { %1774 = vsyncpa [#allocation3], 1 }
 0x55d   :  { %1776 = vsyncpa [#allocation3 + $0x1], 1 }
 0x55e   :  { %1777 = vsyncpa [#allocation5], 1 }

</bundles_post_ra>
